<compile_context>
chip_gen: v5e
topology: v5e:2x2
jax: 0.10.0
libtpu: 0.0.40
codegen_flags: <defaults>
</compile_context>

<pallas_src>
from functools import partial

import jax
import jax.numpy as jnp
from jax.experimental import pallas as pl
from jax.experimental.pallas import tpu as pltpu


# ----------------------------------------------------------------------------
# Generation-aware VMEM budget / TensorCore count
# ----------------------------------------------------------------------------
def _vmem_capacity_bytes():
    try:
        cap = getattr(pltpu.get_tpu_info(), "vmem_capacity_bytes", None)
        if cap:
            return int(cap)
    except Exception:
        pass
    try:
        kind = jax.devices()[0].device_kind.lower()
        if "v7" in kind or "7x" in kind:
            return 64 * 1024 * 1024          # v7x: 64 MiB per TensorCore
        return 128 * 1024 * 1024             # v5e / v6e
    except Exception:
        return 64 * 1024 * 1024              # conservative fallback


def _cores_per_chip():
    try:
        kind = jax.devices()[0].device_kind.lower()
        if "v7" in kind or "7x" in kind:
            return 2
    except Exception:
        pass
    return 1


_VMEM_BUDGET = min(int(_vmem_capacity_bytes() * 3 // 4), 100 * 1024 * 1024)
_CORES = _cores_per_chip()


def _mosaic_params():
    return pltpu.CompilerParams(dimension_semantics=("parallel",),
                                vmem_limit_bytes=_VMEM_BUDGET)


# ----------------------------------------------------------------------------
# Pallas kernels
# ----------------------------------------------------------------------------
def _wxb_kernel(w_ref, p_ref, s_ref, o_ref, *, relu, precision):
    # (N, K) @ (K, tile_m) on the MXU, f32 accumulate, per-row shift (+ReLU).
    acc = jnp.dot(w_ref[...], p_ref[...],
                  preferred_element_type=jnp.float32, precision=precision)
    y = acc + s_ref[...]
    if relu:
        y = jnp.maximum(y, 0.0)
    o_ref[...] = y.astype(o_ref.dtype)


def _wxb_res_kernel(w_ref, p_ref, s_ref, id_ref, o_ref, *, relu, precision):
    # Same as above with the residual identity (f32) fused into the epilogue.
    acc = jnp.dot(w_ref[...], p_ref[...],
                  preferred_element_type=jnp.float32, precision=precision)
    y = acc + s_ref[...] + id_ref[...].astype(jnp.float32)
    if relu:
        y = jnp.maximum(y, 0.0)
    o_ref[...] = y.astype(o_ref.dtype)


def _dual_wxb_kernel(w_ref, p_ref, s_ref, o1_ref, o2_ref, *, rh, precision):
    # ONE matmul over the shared patches (single HBM read of the im2col):
    #   rows [0, rh)      -> conv1 path (+ReLU, compute dtype)
    #   rows [rh, 2*rh)   -> skip / identity path (no ReLU, f32)
    acc = jnp.dot(w_ref[...], p_ref[...],
                  preferred_element_type=jnp.float32, precision=precision)
    y = acc + s_ref[...]
    o1_ref[...] = jnp.maximum(y[:rh, :], 0.0).astype(o1_ref.dtype)
    o2_ref[...] = y[rh:, :].astype(o2_ref.dtype)


def _fc_kernel(z_ref, w_ref, b_ref, o_ref, *, precision):
    acc = jnp.dot(z_ref[...], w_ref[...],
                  preferred_element_type=jnp.float32, precision=precision)
    o_ref[...] = (acc + b_ref[...]).astype(o_ref.dtype)


# ----------------------------------------------------------------------------
# Tiling helpers
# ----------------------------------------------------------------------------
def _round_up(x, n):
    return ((x + n - 1) // n) * n


def _dot_precision(dtype):
    # bf16 operands: single MXU pass (f32 accumulate).  f32 operands: request
    # full precision so the f32 correctness mode is bit-faithful.
    return jax.lax.Precision.HIGHEST if dtype == jnp.float32 else None


def _pick_tile(m, fixed_bytes, per_col_bytes):
    """Lane-dim tile: multiple of 128, as large as the VMEM budget allows
    (dtype-aware byte accounting, double-buffered blocks), >=2 grid blocks
    whenever possible, and on 2-TensorCore chips (v7x) prefer an even grid."""
    budget = max(_VMEM_BUDGET - fixed_bytes, 512 * 1024)
    tile = 1024
    while tile > 128 and (per_col_bytes * tile > budget or m < 2 * tile):
        tile //= 2
    if _CORES >= 2 and tile >= 256:
        g = -(-m // tile)
        if g > 1 and g % 2 == 1 and (-(-m // (tile // 2))) % 2 == 0:
            tile //= 2                      # balance blocks across both TCs
    return tile


# ----------------------------------------------------------------------------
# Fused matmul wrappers
# ----------------------------------------------------------------------------
def fused_wx(w_mat, patches, shift, *, relu, identity=None, out_dtype):
    """out = act(W @ P + shift [+ identity]) with lane-dense (N, M) output."""
    n, k = w_mat.shape
    k2, m = patches.shape
    assert k == k2
    p_it = jnp.dtype(patches.dtype).itemsize
    o_it = jnp.dtype(out_dtype).itemsize
    fixed = n * k * jnp.dtype(w_mat.dtype).itemsize
    per_col = 2 * (k * p_it + n * o_it)
    if identity is not None:
        per_col += 2 * n * jnp.dtype(identity.dtype).itemsize
    tile_m = _pick_tile(m, fixed, per_col)
    m_pad = _round_up(m, tile_m)
    if m_pad != m:
        patches = jnp.pad(patches, ((0, 0), (0, m_pad - m)))
        if identity is not None:
            identity = jnp.pad(identity, ((0, 0), (0, m_pad - m)))

    s2 = shift.reshape(n, 1).astype(jnp.float32)
    precision = _dot_precision(w_mat.dtype)

    in_specs = [
        pl.BlockSpec((n, k), lambda i: (0, 0)),          # small weight, resident
        pl.BlockSpec((k, tile_m), lambda i: (0, i)),     # patches, lane-tiled
        pl.BlockSpec((n, 1), lambda i: (0, 0)),          # per-channel shift
    ]
    args = [w_mat, patches, s2]
    if identity is None:
        kern = partial(_wxb_kernel, relu=relu, precision=precision)
    else:
        kern = partial(_wxb_res_kernel, relu=relu, precision=precision)
        in_specs.append(pl.BlockSpec((n, tile_m), lambda i: (0, i)))
        args.append(identity)

    out = pl.pallas_call(
        kern,
        out_shape=jax.ShapeDtypeStruct((n, m_pad), out_dtype),
        grid=(m_pad // tile_m,),
        in_specs=in_specs,
        out_specs=pl.BlockSpec((n, tile_m), lambda i: (0, i)),
        compiler_params=_mosaic_params(),
    )(*args)
    return out[:, :m] if m_pad != m else out


def fused_dual_wx(w_cat, patches, shift_cat, rh, *, dtype1, dtype2):
    """Two fused heads sharing the same patches: one matmul, two outputs."""
    n2, k = w_cat.shape                      # n2 = 2 * rh
    _, m = patches.shape
    p_it = jnp.dtype(patches.dtype).itemsize
    fixed = n2 * k * jnp.dtype(w_cat.dtype).itemsize
    per_col = 2 * (k * p_it + rh * jnp.dtype(dtype1).itemsize
                   + rh * jnp.dtype(dtype2).itemsize)
    tile_m = _pick_tile(m, fixed, per_col)
    m_pad = _round_up(m, tile_m)
    if m_pad != m:
        patches = jnp.pad(patches, ((0, 0), (0, m_pad - m)))
    precision = _dot_precision(w_cat.dtype)

    o1, o2 = pl.pallas_call(
        partial(_dual_wxb_kernel, rh=rh, precision=precision),
        out_shape=(jax.ShapeDtypeStruct((rh, m_pad), dtype1),
                   jax.ShapeDtypeStruct((rh, m_pad), dtype2)),
        grid=(m_pad // tile_m,),
        in_specs=[
            pl.BlockSpec((n2, k), lambda i: (0, 0)),
            pl.BlockSpec((k, tile_m), lambda i: (0, i)),
            pl.BlockSpec((n2, 1), lambda i: (0, 0)),
        ],
        out_specs=(pl.BlockSpec((rh, tile_m), lambda i: (0, i)),
                   pl.BlockSpec((rh, tile_m), lambda i: (0, i))),
        compiler_params=_mosaic_params(),
    )(w_cat, patches, shift_cat)
    if m_pad != m:
        o1, o2 = o1[:, :m], o2[:, :m]
    return o1, o2


def fc_layer(z, w, b, dtype):
    """out = z @ w + b, tiled (lane-dense) over the wide feature dimension."""
    bsz, l = z.shape
    _, f = w.shape
    wp = w.astype(dtype)
    bp = b.astype(jnp.float32).reshape(1, f)
    it = jnp.dtype(dtype).itemsize
    fixed = bsz * l * it
    per_col = 2 * (l * it + 4 + bsz * it)
    tile_f = _pick_tile(f, fixed, per_col)
    f_pad = _round_up(f, tile_f)
    if f_pad != f:
        wp = jnp.pad(wp, ((0, 0), (0, f_pad - f)))
        bp = jnp.pad(bp, ((0, 0), (0, f_pad - f)))
    precision = _dot_precision(wp.dtype)
    out = pl.pallas_call(
        partial(_fc_kernel, precision=precision),
        out_shape=jax.ShapeDtypeStruct((bsz, f_pad), dtype),
        grid=(f_pad // tile_f,),
        in_specs=[
            pl.BlockSpec((bsz, l), lambda i: (0, 0)),
            pl.BlockSpec((l, tile_f), lambda i: (0, i)),
            pl.BlockSpec((1, tile_f), lambda i: (0, i)),
        ],
        out_specs=pl.BlockSpec((bsz, tile_f), lambda i: (0, i)),
        compiler_params=_mosaic_params(),
    )(z.astype(dtype), wp, bp)
    return out[:, :f] if f_pad != f else out


# ----------------------------------------------------------------------------
# ConvTranspose2d lowerings (JAX glue around the Pallas matmuls)
# ----------------------------------------------------------------------------
def bn_scale_shift(gamma, beta, mean, var, eps=1e-5):
    s = gamma * jax.lax.rsqrt(var + eps)
    return s, beta - mean * s


def _folded_affine(bias, bn):
    """Fold conv bias + BatchNorm into (per-channel weight scale, shift)."""
    s, t = bn_scale_shift(*bn)
    return s, s * bias + t


def _phase_weight_matrix(w_t):
    """ConvTranspose2d weight (C_in, C_out, 4, 4) -> phase-grouped matrix
    (4*C_out, 4*C_in): rows ordered (ph, pw, c_out), cols ordered (a, b, c_in)."""
    cin, cout = w_t.shape[0], w_t.shape[1]
    wf = w_t[:, :, ::-1, ::-1]                       # flipped kernel
    w6 = wf.reshape(cin, cout, 2, 2, 2, 2)           # (ci, co, a, ph, b, pw)
    wm = jnp.transpose(w6, (3, 5, 1, 2, 4, 0))       # (ph, pw, co, a, b, ci)
    return wm.reshape(4 * cout, 4 * cin)


def _phase_patches(act, dtype):
    """(C_in, B, H, W) -> (4*C_in, B*(H+1)*(W+1)) phase-conv patches."""
    c_in, b, h, w = act.shape
    ap = jnp.pad(act, ((0, 0), (0, 0), (1, 1), (1, 1)))
    ho, wo = h + 1, w + 1
    taps = [ap[:, :, a:a + ho, bb:bb + wo] for a in (0, 1) for bb in (0, 1)]
    return jnp.stack(taps, 0).reshape(4 * c_in, b * ho * wo).astype(dtype)


def _phase_interleave(z_rows, c_out, b, h, w):
    """(4*C_out, B*(H+1)*(W+1)) phase layout -> (C_out, B, 2H, 2W)."""
    ho, wo = h + 1, w + 1
    z6 = z_rows.reshape(2, 2, c_out, b, ho, wo)       # (ph, pw, co, b, h', w')
    parts = [[z6[ph, pw, :, :, ph:ph + h, pw:pw + w] for pw in (0, 1)]
             for ph in (0, 1)]
    inner = [jnp.stack(parts[ph], axis=-1) for ph in (0, 1)]   # (co,b,h,w,2)
    return jnp.stack(inner, axis=3).reshape(c_out, b, 2 * h, 2 * w)


def _pad_rows(a, rows):
    return a if a.shape[0] == rows else jnp.pad(a, ((0, rows - a.shape[0]), (0, 0)))


def conv_transpose_4x4_s2(act, w_t, scale, shift, *, relu, dtype, out_dtype=None):
    """ConvTranspose2d(k=4, stride=2, pad=1) via sub-pixel phase decomposition.
    act: (C_in, B, H, W) -> (C_out, B, 2H, 2W)."""
    c_in, b, h, w = act.shape
    c_out = w_t.shape[1]
    out_dtype = dtype if out_dtype is None else out_dtype
    w_mat = (_phase_weight_matrix(w_t) * jnp.tile(scale, 4)[:, None]).astype(dtype)
    patches = _phase_patches(act, dtype)
    z = fused_wx(w_mat, patches, jnp.tile(shift, 4), relu=relu, out_dtype=out_dtype)
    return _phase_interleave(z, c_out, b, h, w)


def conv_transpose_4x4_s2_pair(act, w1_t, scale1, shift1, ws_t, scales, shifts,
                               *, dtype):
    """conv1 (+ReLU) and the skip ConvTranspose2d(4,2,1) fused into ONE Pallas
    matmul over the shared phase patches (single HBM read of the im2col,
    doubled MXU row fill).  Returns (relu(conv1) in `dtype`, identity in f32),
    both shaped (C_out, B, 2H, 2W)."""
    c_in, b, h, w = act.shape
    c_out = w1_t.shape[1]
    n = 4 * c_out
    rh = _round_up(n, 8)                    # sublane-aligned split point

    wm1 = _phase_weight_matrix(w1_t) * jnp.tile(scale1, 4)[:, None]
    wms = _phase_weight_matrix(ws_t) * jnp.tile(scales, 4)[:, None]
    w_cat = jnp.concatenate([_pad_rows(wm1, rh), _pad_rows(wms, rh)], 0).astype(dtype)
    s1 = jnp.pad(jnp.tile(shift1, 4), (0, rh - n))
    ss = jnp.pad(jnp.tile(shifts, 4), (0, rh - n))
    s_cat = jnp.concatenate([s1, ss], 0).reshape(2 * rh, 1).astype(jnp.float32)

    patches = _phase_patches(act, dtype)
    h_rows, id_rows = fused_dual_wx(w_cat, patches, s_cat, rh,
                                    dtype1=dtype, dtype2=jnp.float32)
    y = _phase_interleave(h_rows[:n], c_out, b, h, w)
    identity = _phase_interleave(id_rows[:n], c_out, b, h, w)   # f32 residual
    return y, identity


def conv_transpose_3x3_s1(act, w_t, scale, shift, *, relu, identity=None, dtype):
    """ConvTranspose2d(k=3, stride=1, pad=1) == flipped-kernel 3x3 conv, pad 1.
    Optionally fuses a residual `identity` (f32) add before the ReLU."""
    c_in, b, h, w = act.shape
    c_out = w_t.shape[1]

    wf = w_t[:, :, ::-1, ::-1]                                  # (ci, co, 3, 3)
    w_mat = jnp.transpose(wf, (1, 2, 3, 0)).reshape(c_out, 9 * c_in)
    w_mat = (w_mat * scale[:, None]).astype(dtype)

    ap = jnp.pad(act, ((0, 0), (0, 0), (1, 1), (1, 1)))
    taps = [ap[:, :, a:a + h, bb:bb + w] for a in range(3) for bb in range(3)]
    patches = jnp.stack(taps, 0).reshape(9 * c_in, b * h * w).astype(dtype)
    # TODO(synk): fold the tap gather into the kernel (halo block / tap grid
    #             axis) to avoid materializing the 9x im2col in HBM.

    id_flat = None if identity is None else identity.reshape(c_out, b * h * w)
    y = fused_wx(w_mat, patches, shift, relu=relu, identity=id_flat,
                 out_dtype=dtype)
    return y.reshape(c_out, b, h, w)


# ----------------------------------------------------------------------------
# Decoder forward (Pallas path)
# ----------------------------------------------------------------------------
def residual_block_upsample(x, p, dtype):
    s1, t1 = _folded_affine(p["conv1_b"], p["bn1"])
    s2, t2 = _folded_affine(p["conv2_b"], p["bn2"])
    ss, ts = _folded_affine(p["skip_b"], p["bn_skip"])
    # conv1 and skip share the same patches -> one fused Pallas matmul; the
    # identity comes back in f32 (no bf16 rounding on the residual path).
    h_act, identity = conv_transpose_4x4_s2_pair(
        x, p["conv1_w"], s1, t1, p["skip_w"], ss, ts, dtype=dtype)
    # conv2 + BN2 + residual add + ReLU fused into one Pallas kernel.
    return conv_transpose_3x3_s1(h_act, p["conv2_w"], s2, t2, relu=True,
                                 identity=identity, dtype=dtype)


def decoder_forward(z, params, channels, dtype=jnp.bfloat16):
    c0 = channels[0]
    x = fc_layer(z, params["fc_w"], params["fc_b"], dtype)        # (B, feat)
    b = z.shape[0]
    x = x.reshape(b, c0, 12, 16)
    x = jnp.transpose(x, (1, 0, 2, 3))                            # (C0, B, 12, 16)
    for bp in params["blocks"]:
        x = residual_block_upsample(x, bp, dtype)
    c_out = channels[-1]
    ones = jnp.ones((c_out,), jnp.float32)
    # Final layer writes float32 directly from its (already f32) epilogue.
    x = conv_transpose_4x4_s2(x, params["final_w"], ones,
                              params["final_b"].astype(jnp.float32),
                              relu=False, dtype=dtype, out_dtype=jnp.float32)
    return jnp.transpose(x, (1, 0, 2, 3))                         # NCHW, f32


# ----------------------------------------------------------------------------
# Pure-JAX reference (dense lhs-dilated conv, HIGHEST precision)
# ----------------------------------------------------------------------------
def _ref_conv_transpose(x_nhwc, w_t, bias, stride, padding):
    k = w_t.shape[2]
    w_eff = jnp.transpose(w_t[:, :, ::-1, ::-1], (2, 3, 0, 1))    # HWIO
    pad = k - 1 - padding
    y = jax.lax.conv_general_dilated(
        x_nhwc, w_eff, window_strides=(1, 1),
        padding=[(pad, pad), (pad, pad)],
        lhs_dilation=(stride, stride),
        dimension_numbers=("NHWC", "HWIO", "NHWC"),
        precision=jax.lax.Precision.HIGHEST,
    )
    return y + bias


def _ref_decoder_forward(z, params, channels):
    c0 = channels[0]
    x = jnp.dot(z, params["fc_w"], precision=jax.lax.Precision.HIGHEST) + params["fc_b"]
    b = z.shape[0]
    x = x.reshape(b, c0, 12, 16)
    x = jnp.transpose(x, (0, 2, 3, 1))
    for p in params["blocks"]:
        s1, t1 = bn_scale_shift(*p["bn1"])
        s2, t2 = bn_scale_shift(*p["bn2"])
        ss, ts = bn_scale_shift(*p["bn_skip"])
        identity = _ref_conv_transpose(x, p["skip_w"], p["skip_b"], 2, 1) * ss + ts
        out = jnp.maximum(
            _ref_conv_transpose(x, p["conv1_w"], p["conv1_b"], 2, 1) * s1 + t1, 0.0)
        out = _ref_conv_transpose(out, p["conv2_w"], p["conv2_b"], 1, 1) * s2 + t2
        x = jnp.maximum(out + identity, 0.0)
    x = _ref_conv_transpose(x, params["final_w"], params["final_b"], 2, 1)
    return jnp.transpose(x, (0, 3, 1, 2))


# ----------------------------------------------------------------------------
# Deterministic parameter init (synthetic weights)
# ----------------------------------------------------------------------------
def init_params(key, channels, latent_dim):
    feature_dim = channels[0] * 12 * 16
    keys = iter(jax.random.split(key, 256))

    def nrm(shape, scale=0.1):
        return (scale * jax.random.normal(next(keys), shape)).astype(jnp.float32)

    def bn(c):
        gamma = jax.random.uniform(next(keys), (c,), minval=0.5, maxval=1.5).astype(jnp.float32)
        beta = nrm((c,), 0.05)
        mean = nrm((c,), 0.05)
        var = jax.random.uniform(next(keys), (c,), minval=0.5, maxval=1.5).astype(jnp.float32)
        return (gamma, beta, mean, var)

    params = {
        "fc_w": nrm((latent_dim, feature_dim)),
        "fc_b": nrm((feature_dim,)),
        "blocks": [],
        "final_w": nrm((channels[-2], channels[-1], 4, 4)),
        "final_b": nrm((channels[-1],)),
    }
    for i in range(len(channels) - 2):
        cin, cout = channels[i], channels[i + 1]
        params["blocks"].append({
            "conv1_w": nrm((cin, cout, 4, 4)), "conv1_b": nrm((cout,)), "bn1": bn(cout),
            "conv2_w": nrm((cout, cout, 3, 3)), "conv2_b": nrm((cout,)), "bn2": bn(cout),
            "skip_w": nrm((cin, cout, 4, 4)), "skip_b": nrm((cout,)), "bn_skip": bn(cout),
        })
    return params


# ----------------------------------------------------------------------------
if __name__ == "__main__":
    channels = [8, 8, 4]        # 1 upsample ResidualBlock (8->8) + final convT (8->4)
    latent_dim = 16
    batch = 2

    key = jax.random.PRNGKey(0)
    kz, kp = jax.random.split(key)
    z = jax.random.normal(kz, (batch, latent_dim), dtype=jnp.float32)
    params = init_params(kp, channels, latent_dim)

    fwd_bf16 = jax.jit(lambda zz, pp: decoder_forward(zz, pp, channels, jnp.bfloat16))
    fwd_f32 = jax.jit(lambda zz, pp: decoder_forward(zz, pp, channels, jnp.float32))

    out_bf16 = jax.block_until_ready(fwd_bf16(z, params))
    out_f32 = jax.block_until_ready(fwd_f32(z, params))
    ref = jax.block_until_ready(_ref_decoder_forward(z, params, channels))

    expected_shape = (batch, channels[-1], 12 * 2 ** (len(channels) - 1),
                      16 * 2 ** (len(channels) - 1))
    assert out_bf16.shape == expected_shape, (out_bf16.shape, expected_shape)
    assert out_f32.shape == expected_shape, (out_f32.shape, expected_shape)

    denom = float(jnp.max(jnp.abs(ref))) + 1e-12
    err_f32 = float(jnp.max(jnp.abs(out_f32 - ref))) / denom
    err_bf16 = float(jnp.max(jnp.abs(out_bf16 - ref))) / denom
    # f32 mode: tight consistency check (layout / indexing bugs would be O(1)).
    assert err_f32 < 1e-4, f"f32-mode relative error too high: {err_f32}"
    # bf16 operand mode (the perf path): bf16-rounded operands, f32 accumulate.
    assert err_bf16 < 5e-2, f"bf16-mode relative error too high: {err_bf16}"

    print("KERNEL_OK")
</pallas_src>

<mosaic_0001>
module attributes {stable_mosaic.version = 11 : i64} {
  func.func @_fc_kernel(%arg0: i32, %arg1: memref<2x16xbf16, #tpu.memory_space<vmem>>, %arg2: memref<16x512xbf16, #tpu.memory_space<vmem>>, %arg3: memref<1x512xf32, #tpu.memory_space<vmem>>, %arg4: memref<2x512xbf16, #tpu.memory_space<vmem>>) attributes {dimension_semantics = [#tpu.dimension_semantics<parallel>], iteration_bounds = array<i64: 3>, scalar_prefetch = 0 : i64, scratch_operands = 0 : i64, tpu.core_type = #tpu.core_type<tc>, window_params = [{pipeline_mode = #tpu.pipeline_mode<synchronous>, transform_indices = @transform_0, window_bounds = array<i64: 2, 16>}, {transform_indices = @transform_1, window_bounds = array<i64: 16, 512>}, {transform_indices = @transform_2, window_bounds = array<i64: 1, 512>}, {transform_indices = @transform_3, window_bounds = array<i64: 2, 512>}]} {
    %c0 = arith.constant 0 : index
    %c0_0 = arith.constant 0 : index
    %0 = vector.load %arg1[%c0, %c0_0] : memref<2x16xbf16, #tpu.memory_space<vmem>>, vector<2x16xbf16>
    %c0_1 = arith.constant 0 : index
    %c0_2 = arith.constant 0 : index
    %1 = vector.load %arg2[%c0_1, %c0_2] : memref<16x512xbf16, #tpu.memory_space<vmem>>, vector<16x512xbf16>
    %cst = arith.constant dense<0.000000e+00> : vector<2x512xf32>
    %2 = tpu.matmul %0, %1, %cst {dimension_numbers = #tpu.dot_dimension_numbers<[1], [0], [0], [1], [0, 0, 1, 1], [], []>} : vector<2x16xbf16>, vector<16x512xbf16>, vector<2x512xf32> -> vector<2x512xf32>
    %c0_3 = arith.constant 0 : index
    %c0_4 = arith.constant 0 : index
    %3 = vector.load %arg3[%c0_3, %c0_4] : memref<1x512xf32, #tpu.memory_space<vmem>>, vector<1x512xf32>
    %4 = vector.broadcast %3 : vector<1x512xf32> to vector<2x512xf32>
    %5 = arith.addf %2, %4 : vector<2x512xf32>
    %6 = arith.truncf %5 : vector<2x512xf32> to vector<2x512xbf16>
    %c0_5 = arith.constant 0 : index
    %c0_6 = arith.constant 0 : index
    %7 = vector.load %arg4[%c0_5, %c0_6] : memref<2x512xbf16, #tpu.memory_space<vmem>>, vector<2x512xbf16>
    tpu.vector_store %arg4[%c0_5, %c0_6], %6 {strides = array<i32>} : memref<2x512xbf16, #tpu.memory_space<vmem>>, vector<2x512xbf16>,
    return
  }
  func.func @transform_0(%arg0: i32) -> (i32, i32) {
    %c0_i32 = arith.constant 0 : i32
    %c0_i32_0 = arith.constant 0 : i32
    %c0_i32_1 = arith.constant 0 : i32
    return %c0_i32, %c0_i32_0 : i32, i32
  }
  func.func @transform_1(%arg0: i32) -> (i32, i32) {
    %c0_i32 = arith.constant 0 : i32
    %c0_i32_0 = arith.constant 0 : i32
    return %c0_i32, %arg0 : i32, i32
  }
  func.func @transform_2(%arg0: i32) -> (i32, i32) {
    %c0_i32 = arith.constant 0 : i32
    %c0_i32_0 = arith.constant 0 : i32
    return %c0_i32, %arg0 : i32, i32
  }
  func.func @transform_3(%arg0: i32) -> (i32, i32) {
    %c0_i32 = arith.constant 0 : i32
    %c0_i32_0 = arith.constant 0 : i32
    return %c0_i32, %arg0 : i32, i32
  }
}

module attributes {stable_mosaic.version = 11 : i64} {
  func.func @_dual_wxb_kernel(%arg0: i32, %arg1: memref<64x32xbf16, #tpu.memory_space<vmem>>, %arg2: memref<32x128xbf16, #tpu.memory_space<vmem>>, %arg3: memref<64x1xf32, #tpu.memory_space<vmem>>, %arg4: memref<32x128xbf16, #tpu.memory_space<vmem>>, %arg5: memref<32x128xf32, #tpu.memory_space<vmem>>) attributes {dimension_semantics = [#tpu.dimension_semantics<parallel>], iteration_bounds = array<i64: 4>, scalar_prefetch = 0 : i64, scratch_operands = 0 : i64, tpu.core_type = #tpu.core_type<tc>, window_params = [{pipeline_mode = #tpu.pipeline_mode<synchronous>, transform_indices = @transform_0, window_bounds = array<i64: 64, 32>}, {transform_indices = @transform_1, window_bounds = array<i64: 32, 128>}, {pipeline_mode = #tpu.pipeline_mode<synchronous>, transform_indices = @transform_2, window_bounds = array<i64: 64, 1>}, {transform_indices = @transform_3, window_bounds = array<i64: 32, 128>}, {transform_indices = @transform_4, window_bounds = array<i64: 32, 128>}]} {
    %c0 = arith.constant 0 : index
    %c0_0 = arith.constant 0 : index
    %0 = vector.load %arg1[%c0, %c0_0] : memref<64x32xbf16, #tpu.memory_space<vmem>>, vector<64x32xbf16>
    %c0_1 = arith.constant 0 : index
    %c0_2 = arith.constant 0 : index
    %1 = vector.load %arg2[%c0_1, %c0_2] : memref<32x128xbf16, #tpu.memory_space<vmem>>, vector<32x128xbf16>
    %cst = arith.constant dense<0.000000e+00> : vector<64x128xf32>
    %2 = tpu.matmul %0, %1, %cst {dimension_numbers = #tpu.dot_dimension_numbers<[1], [0], [0], [1], [0, 0, 1, 1], [], []>} : vector<64x32xbf16>, vector<32x128xbf16>, vector<64x128xf32> -> vector<64x128xf32>
    %c0_3 = arith.constant 0 : index
    %c0_4 = arith.constant 0 : index
    %3 = vector.load %arg3[%c0_3, %c0_4] : memref<64x1xf32, #tpu.memory_space<vmem>>, vector<64x1xf32>
    %4 = vector.broadcast %3 : vector<64x1xf32> to vector<64x128xf32>
    %5 = arith.addf %2, %4 : vector<64x128xf32>
    %6 = vector.extract_strided_slice %5 {offsets = [0, 0], sizes = [32, 128], strides = [1, 1]} : vector<64x128xf32> to vector<32x128xf32>
    %cst_5 = arith.constant 0.000000e+00 : f32
    %7 = vector.broadcast %cst_5 : f32 to vector<32x128xf32>
    %8 = arith.maximumf %6, %7 : vector<32x128xf32>
    %9 = arith.truncf %8 : vector<32x128xf32> to vector<32x128xbf16>
    %c0_6 = arith.constant 0 : index
    %c0_7 = arith.constant 0 : index
    %10 = vector.load %arg4[%c0_6, %c0_7] : memref<32x128xbf16, #tpu.memory_space<vmem>>, vector<32x128xbf16>
    tpu.vector_store %arg4[%c0_6, %c0_7], %9 {strides = array<i32>} : memref<32x128xbf16, #tpu.memory_space<vmem>>, vector<32x128xbf16>,
    %11 = vector.extract_strided_slice %5 {offsets = [32, 0], sizes = [32, 128], strides = [1, 1]} : vector<64x128xf32> to vector<32x128xf32>
    %c0_8 = arith.constant 0 : index
    %c0_9 = arith.constant 0 : index
    %12 = vector.load %arg5[%c0_8, %c0_9] : memref<32x128xf32, #tpu.memory_space<vmem>>, vector<32x128xf32>
    tpu.vector_store %arg5[%c0_8, %c0_9], %11 {strides = array<i32>} : memref<32x128xf32, #tpu.memory_space<vmem>>, vector<32x128xf32>,
    return
  }
  func.func @transform_0(%arg0: i32) -> (i32, i32) {
    %c0_i32 = arith.constant 0 : i32
    %c0_i32_0 = arith.constant 0 : i32
    %c0_i32_1 = arith.constant 0 : i32
    return %c0_i32, %c0_i32_0 : i32, i32
  }
  func.func @transform_1(%arg0: i32) -> (i32, i32) {
    %c0_i32 = arith.constant 0 : i32
    %c0_i32_0 = arith.constant 0 : i32
    return %c0_i32, %arg0 : i32, i32
  }
  func.func @transform_2(%arg0: i32) -> (i32, i32) {
    %c0_i32 = arith.constant 0 : i32
    %c0_i32_0 = arith.constant 0 : i32
    %c0_i32_1 = arith.constant 0 : i32
    return %c0_i32, %c0_i32_0 : i32, i32
  }
  func.func @transform_3(%arg0: i32) -> (i32, i32) {
    %c0_i32 = arith.constant 0 : i32
    %c0_i32_0 = arith.constant 0 : i32
    return %c0_i32, %arg0 : i32, i32
  }
  func.func @transform_4(%arg0: i32) -> (i32, i32) {
    %c0_i32 = arith.constant 0 : i32
    %c0_i32_0 = arith.constant 0 : i32
    return %c0_i32, %arg0 : i32, i32
  }
}

module attributes {stable_mosaic.version = 11 : i64} {
  func.func @_wxb_res_kernel(%arg0: i32, %arg1: memref<8x72xbf16, #tpu.memory_space<vmem>>, %arg2: memref<72x512xbf16, #tpu.memory_space<vmem>>, %arg3: memref<8x1xf32, #tpu.memory_space<vmem>>, %arg4: memref<8x512xf32, #tpu.memory_space<vmem>>, %arg5: memref<8x512xbf16, #tpu.memory_space<vmem>>) attributes {dimension_semantics = [#tpu.dimension_semantics<parallel>], iteration_bounds = array<i64: 3>, scalar_prefetch = 0 : i64, scratch_operands = 0 : i64, tpu.core_type = #tpu.core_type<tc>, window_params = [{pipeline_mode = #tpu.pipeline_mode<synchronous>, transform_indices = @transform_0, window_bounds = array<i64: 8, 72>}, {transform_indices = @transform_1, window_bounds = array<i64: 72, 512>}, {pipeline_mode = #tpu.pipeline_mode<synchronous>, transform_indices = @transform_2, window_bounds = array<i64: 8, 1>}, {transform_indices = @transform_3, window_bounds = array<i64: 8, 512>}, {transform_indices = @transform_4, window_bounds = array<i64: 8, 512>}]} {
    %c0 = arith.constant 0 : index
    %c0_0 = arith.constant 0 : index
    %0 = vector.load %arg1[%c0, %c0_0] : memref<8x72xbf16, #tpu.memory_space<vmem>>, vector<8x72xbf16>
    %c0_1 = arith.constant 0 : index
    %c0_2 = arith.constant 0 : index
    %1 = vector.load %arg2[%c0_1, %c0_2] : memref<72x512xbf16, #tpu.memory_space<vmem>>, vector<72x512xbf16>
    %cst = arith.constant dense<0.000000e+00> : vector<8x512xf32>
    %2 = tpu.matmul %0, %1, %cst {dimension_numbers = #tpu.dot_dimension_numbers<[1], [0], [0], [1], [0, 0, 1, 1], [], []>} : vector<8x72xbf16>, vector<72x512xbf16>, vector<8x512xf32> -> vector<8x512xf32>
    %c0_3 = arith.constant 0 : index
    %c0_4 = arith.constant 0 : index
    %3 = vector.load %arg3[%c0_3, %c0_4] : memref<8x1xf32, #tpu.memory_space<vmem>>, vector<8x1xf32>
    %4 = vector.broadcast %3 : vector<8x1xf32> to vector<8x512xf32>
    %5 = arith.addf %2, %4 : vector<8x512xf32>
    %c0_5 = arith.constant 0 : index
    %c0_6 = arith.constant 0 : index
    %6 = vector.load %arg4[%c0_5, %c0_6] : memref<8x512xf32, #tpu.memory_space<vmem>>, vector<8x512xf32>
    %7 = arith.addf %5, %6 : vector<8x512xf32>
    %cst_7 = arith.constant 0.000000e+00 : f32
    %8 = vector.broadcast %cst_7 : f32 to vector<8x512xf32>
    %9 = arith.maximumf %7, %8 : vector<8x512xf32>
    %10 = arith.truncf %9 : vector<8x512xf32> to vector<8x512xbf16>
    %c0_8 = arith.constant 0 : index
    %c0_9 = arith.constant 0 : index
    %11 = vector.load %arg5[%c0_8, %c0_9] : memref<8x512xbf16, #tpu.memory_space<vmem>>, vector<8x512xbf16>
    tpu.vector_store %arg5[%c0_8, %c0_9], %10 {strides = array<i32>} : memref<8x512xbf16, #tpu.memory_space<vmem>>, vector<8x512xbf16>,
    return
  }
  func.func @transform_0(%arg0: i32) -> (i32, i32) {
    %c0_i32 = arith.constant 0 : i32
    %c0_i32_0 = arith.constant 0 : i32
    %c0_i32_1 = arith.constant 0 : i32
    return %c0_i32, %c0_i32_0 : i32, i32
  }
  func.func @transform_1(%arg0: i32) -> (i32, i32) {
    %c0_i32 = arith.constant 0 : i32
    %c0_i32_0 = arith.constant 0 : i32
    return %c0_i32, %arg0 : i32, i32
  }
  func.func @transform_2(%arg0: i32) -> (i32, i32) {
    %c0_i32 = arith.constant 0 : i32
    %c0_i32_0 = arith.constant 0 : i32
    %c0_i32_1 = arith.constant 0 : i32
    return %c0_i32, %c0_i32_0 : i32, i32
  }
  func.func @transform_3(%arg0: i32) -> (i32, i32) {
    %c0_i32 = arith.constant 0 : i32
    %c0_i32_0 = arith.constant 0 : i32
    return %c0_i32, %arg0 : i32, i32
  }
  func.func @transform_4(%arg0: i32) -> (i32, i32) {
    %c0_i32 = arith.constant 0 : i32
    %c0_i32_0 = arith.constant 0 : i32
    return %c0_i32, %arg0 : i32, i32
  }
}

module attributes {stable_mosaic.version = 11 : i64} {
  func.func @_wxb_kernel(%arg0: i32, %arg1: memref<16x32xbf16, #tpu.memory_space<vmem>>, %arg2: memref<32x512xbf16, #tpu.memory_space<vmem>>, %arg3: memref<16x1xf32, #tpu.memory_space<vmem>>, %arg4: memref<16x512xf32, #tpu.memory_space<vmem>>) attributes {dimension_semantics = [#tpu.dimension_semantics<parallel>], iteration_bounds = array<i64: 4>, scalar_prefetch = 0 : i64, scratch_operands = 0 : i64, tpu.core_type = #tpu.core_type<tc>, window_params = [{pipeline_mode = #tpu.pipeline_mode<synchronous>, transform_indices = @transform_0, window_bounds = array<i64: 16, 32>}, {transform_indices = @transform_1, window_bounds = array<i64: 32, 512>}, {pipeline_mode = #tpu.pipeline_mode<synchronous>, transform_indices = @transform_2, window_bounds = array<i64: 16, 1>}, {transform_indices = @transform_3, window_bounds = array<i64: 16, 512>}]} {
    %c0 = arith.constant 0 : index
    %c0_0 = arith.constant 0 : index
    %0 = vector.load %arg1[%c0, %c0_0] : memref<16x32xbf16, #tpu.memory_space<vmem>>, vector<16x32xbf16>
    %c0_1 = arith.constant 0 : index
    %c0_2 = arith.constant 0 : index
    %1 = vector.load %arg2[%c0_1, %c0_2] : memref<32x512xbf16, #tpu.memory_space<vmem>>, vector<32x512xbf16>
    %cst = arith.constant dense<0.000000e+00> : vector<16x512xf32>
    %2 = tpu.matmul %0, %1, %cst {dimension_numbers = #tpu.dot_dimension_numbers<[1], [0], [0], [1], [0, 0, 1, 1], [], []>} : vector<16x32xbf16>, vector<32x512xbf16>, vector<16x512xf32> -> vector<16x512xf32>
    %c0_3 = arith.constant 0 : index
    %c0_4 = arith.constant 0 : index
    %3 = vector.load %arg3[%c0_3, %c0_4] : memref<16x1xf32, #tpu.memory_space<vmem>>, vector<16x1xf32>
    %4 = vector.broadcast %3 : vector<16x1xf32> to vector<16x512xf32>
    %5 = arith.addf %2, %4 : vector<16x512xf32>
    %c0_5 = arith.constant 0 : index
    %c0_6 = arith.constant 0 : index
    %6 = vector.load %arg4[%c0_5, %c0_6] : memref<16x512xf32, #tpu.memory_space<vmem>>, vector<16x512xf32>
    tpu.vector_store %arg4[%c0_5, %c0_6], %5 {strides = array<i32>} : memref<16x512xf32, #tpu.memory_space<vmem>>, vector<16x512xf32>,
    return
  }
  func.func @transform_0(%arg0: i32) -> (i32, i32) {
    %c0_i32 = arith.constant 0 : i32
    %c0_i32_0 = arith.constant 0 : i32
    %c0_i32_1 = arith.constant 0 : i32
    return %c0_i32, %c0_i32_0 : i32, i32
  }
  func.func @transform_1(%arg0: i32) -> (i32, i32) {
    %c0_i32 = arith.constant 0 : i32
    %c0_i32_0 = arith.constant 0 : i32
    return %c0_i32, %arg0 : i32, i32
  }
  func.func @transform_2(%arg0: i32) -> (i32, i32) {
    %c0_i32 = arith.constant 0 : i32
    %c0_i32_0 = arith.constant 0 : i32
    %c0_i32_1 = arith.constant 0 : i32
    return %c0_i32, %c0_i32_0 : i32, i32
  }
  func.func @transform_3(%arg0: i32) -> (i32, i32) {
    %c0_i32 = arith.constant 0 : i32
    %c0_i32_0 = arith.constant 0 : i32
    return %c0_i32, %arg0 : i32, i32
  }
}

</mosaic_0001>

<bundles_post_ra>
// kernel: tile.43
= control target key start
LH: loop header
LB: loop body
LE: loop exit
PB: predicated region body
PF: predicated region fallthrough
CT: control target
= control target key end

     0   :  { %s22_s0 = inlined_call_operand.vmem [shape: f32[8], index: 0, kind: input, shape index: {}]   ;;  %s23_s1 = inlined_call_operand.vmem [shape: f32[4,8], index: 1, kind: output, shape index: {}]  }
   0x1   :  { %v4_v0 = vld [vmem:[%s22_s0] ss:$0 sm:$0xff] }
   0x2   :  { %5 = vst [vmem:[%s23_s1] sm:$0xf] %v4_v0 }

// kernel: tile.44
= control target key start
LH: loop header
LB: loop body
LE: loop exit
PB: predicated region body
PF: predicated region fallthrough
CT: control target
= control target key end

     0   :  { %s37_s8 = smov 8   ;;  %s38_s9 = smov 16   ;;  %vm7_vm0 = vcmask 64512   ;;  %vm13_vm1 = vcmask 261312   ;;  %vm19_vm2 = vcmask 195712   ;;  %vm25_vm3 = vcmask 130112   ;;  %s55_s0 = inlined_call_operand.vmem [shape: f32[4,8], index: 0, kind: input, shape index: {}]   ;;  %s56_s1 = inlined_call_operand.vmem [shape: f32[32], index: 1, kind: output, shape index: {}]  }
   0x1   :  { %v4_v0 = vld [vmem:[%s55_s0] sm:$0xf]  ;;  %s36_s0 = smov 24  }
   0x2   :  { %5 = vst [vmem:[#allocation1] sm:$0xf] %v4_v0 }
   0x9   :  { %v10_v1 = vld [vmem:[#allocation1 + $0x3] sm:$0x1]   ;;  %v22_v2 = vld [vmem:[#allocation1 + $0x1] sm:$0x1]   ;;  %v16_v3 = vld [vmem:[#allocation1 + $0x2] sm:$0x1]  }
   0xa   :  { %11 = vrot.lane.b32.xlu0 %v10_v1, %s36_s0  ;;  %23 = vrot.lane.b32.xlu1 %v22_v2, %s37_s8  ;;  %v6_v4 = vld [vmem:[#allocation1] sm:$0x1]  }
   0xb   :  { %8 = vst.msk [vmem:[#allocation0] sm:$0x1] %vm7_vm0, %v6_v4  }
  0x12   :  { %17 = vrot.lane.b32.xlu0 %v16_v3, %s38_s9 }
  0x7c   :  { %v12_v5 = vpop.permute.xlu0 %11   ;;  %v24_v6 = vpop.permute.xlu1 %23  }
  0x7d   :  { %14 = vst.msk [vmem:[#allocation0] sm:$0x1] %vm13_vm1, %v12_v5  }
  0x84   :  { %v18_v7 = vpop.permute.xlu0 %17  }
  0x85   :  { %20 = vst.msk [vmem:[#allocation0] sm:$0x1] %vm19_vm2, %v18_v7  }
  0x86   :  { %26 = vst.msk [vmem:[#allocation0] sm:$0x1] %vm25_vm3, %v24_v6  }
  0x8d   :  { %v29_v8 = vld [vmem:[#allocation0] sm:$0x1] }
  0x8e   :  { %32 = vst [vmem:[%s56_s1] sm:$0x1] %v29_v8 }

// kernel: tile.48
= control target key start
LH: loop header
LB: loop body
LE: loop exit
PB: predicated region body
PF: predicated region fallthrough
CT: control target
= control target key end

     0   :  { %2 = vsyncpa [#allocation1], 0  ;;  %s48_s8 = smov [#allocation0]   ;;  %s65_s0 = inlined_call_operand.hbm [shape: f32[4], index: 0, kind: input, shape index: {}]   ;;  %s66_s1 = inlined_call_operand.vmem [shape: f32[4,4], index: 1, kind: output, shape index: {}]  }
   0x1   :  { %s8_s0 = sshll.u32 %s65_s0, 4  ;;  %s10_s9 = sshll.u32 %s48_s8, 4  ;;  %s9_s0 = int_to_ptr.hbm [resolvable:$true] %s8_s0  ;;  %s11_s9 = int_to_ptr.vmem [resolvable:$true] %s10_s9 }
   0x2   :  { %13 = dma.hbm_to_vmem [thread:$0]  %s9_s0, 16, %s11_s9, [#allocation1]  }
   0x3   :  { %46 = dma.done.wait [#allocation1], 16  }
   0x4   :  { %47 = vsyncadd [#allocation1], 4294967280  ;;  %v18_v0 = vld [vmem:[#allocation0] ss:$0 sm:$0xff] }
   0x5   :  { %19 = vst [vmem:[%s66_s1] sm:$0xf] %v18_v0 }
   0x6   :  { %20 = vsyncpa [#allocation1], 1 }

// kernel: tile.0
= control target key start
LH: loop header
LB: loop body
LE: loop exit
PB: predicated region body
PF: predicated region fallthrough
CT: control target
= control target key end

     0   :  { %s34_s8 = smov 125   ;;  %s35_s9 = smov 126   ;;  %vm7_vm0 = vcmask 7168   ;;  %s61_s0 = inlined_call_operand.vmem [shape: f32[4,4], index: 0, kind: input, shape index: {}]   ;;  %s62_s1 = inlined_call_operand.vmem [shape: f32[16,1], index: 1, kind: output, shape index: {}]  }
   0x1   :  { %v4_v0 = vld [vmem:[%s61_s0] sm:$0xf]  ;;  %s33_s0 = smov 127  }
   0x2   :  { %5 = vst [vmem:[#allocation0] sm:$0xf] %v4_v0 }
   0x9   :  { %v9_v1 = vld [vmem:[#allocation0] sm:$0xf]  }
   0xa   :  { %v21_v2 = vld [vmem:[#allocation0] sm:$0xf]   ;;  %10 = vrot.lane.b32.xlu0 %v9_v1, %s33_s0 }
   0xb   :  { %22 = vrot.lane.b32.xlu1 %v21_v2, %s34_s8  ;;  %v15_v3 = vld [vmem:[#allocation0] sm:$0xf]  }
   0xc   :  { %v6_v4 = vld [vmem:[#allocation0] sm:$0xf]  }
   0xd   :  { %8 = vst.msk [vmem:[%s62_s1] ss:$4 sm:$0xf] %vm7_vm0, %v6_v4  }
  0x12   :  { %16 = vrot.lane.b32.xlu0 %v15_v3, %s35_s9 }
  0x7c   :  { %v11_v5 = vpop.permute.xlu0 %10  }
  0x7d   :  { %v23_v6 = vpop.permute.xlu1 %22   ;;  %27 = vst.msk [vmem:[%s62_s1 + $0x1] ss:$4 sm:$0xf] %vm7_vm0, %v11_v5  }
  0x7e   :  { %29 = vst.msk [vmem:[%s62_s1 + $0x3] ss:$4 sm:$0xf] %vm7_vm0, %v23_v6  }
  0x84   :  { %v17_v7 = vpop.permute.xlu0 %16  }
  0x85   :  { %28 = vst.msk [vmem:[%s62_s1 + $0x2] ss:$4 sm:$0xf] %vm7_vm0, %v17_v7  }

// kernel: _lambda_.4
= control target key start
LH: loop header
LB: loop body
LE: loop exit
PB: predicated region body
PF: predicated region fallthrough
CT: control target
= control target key end

     0   :  { %s498_s12 = smov 0   ;;  %s500_s13 = smov 0   ;;  %s560_s0 = inlined_call_operand.vmem [shape: bf16[2,16], index: 0, kind: input, shape index: {}]   ;;  %s561_s1 = inlined_call_operand.vmem [shape: bf16[16,1536], index: 1, kind: input, shape index: {}]   ;;  %s562_s2 = inlined_call_operand.vmem [shape: f32[1,1536], index: 2, kind: input, shape index: {}]   ;;  %s563_s3 = inlined_call_operand.vmem [shape: bf16[2,1536], index: 3, kind: output, shape index: {}]  }
   0x1   :  { %s502_s14 = smov 0  }
   0x2 LB: > { %s392_s15 = sadd.s32 4294967295, %s476_s14   ;;  %s515_s16 = sadd.s32 1, %s476_s14   ;;  %s476_s14 = sphi %s502_s14, %s566_s14   ;;  %s472_s13 = sphi %s500_s13, %s565_s13   ;;  %s468_s12 = sphi %s498_s12, %s564_s12  }
   0x3   : > { %s38_s17 = ssub.s32 %s476_s14, %s515_s16  ;;  %s41_s18 = sadd.s32 1, %s472_s13 }
   0x4   : > { %p39_p0 = scmp.eq.s32.totalorder %s38_s17, 0  ;;  %p48_p1 = scmp.ne.s32.totalorder %s472_s13, %s468_s12 }
   0x5   : > { %p49_p2 = scmp.eq.s32.totalorder %s476_s14, 0  ;;  %p395_p4 = scmp.ge.s32.totalorder %s476_s14, 3 }
   0x6   : > { %s524_s19 = scalar_select %p39_p0, %s472_s13, %s41_s18  }
   0x7   : > { %p50_p3 = por %p49_p2, %p48_p1  ;;  %129 = sbr.rel (%p395_p4) target bundleno = 20 (0x14), region = 20 }
   0xc   : > { %132 = sbr.rel (!%p50_p3) target bundleno = 20 (0x14), region = 24  ;;  %s134_s20 = sand.u32 (%p50_p3), 1, %s472_s13  }
   0xd   : > { %s425_s21 = sshll.u32 (%p50_p3), %s476_s14, 4  ;;  %s396_s22 = sshll.u32 (%p50_p3), %s134_s20, 5 }
   0xe   : > { %s139_s25 = scalar_lea.vmem (%p50_p3), %s561_s1, %s425_s21  ;;  %s136_s26 = scalar_lea.vmem (%p50_p3), [#allocation2], %s396_s22 }
   0xf   : > { %v152_v0 = vld [vmem:[%s139_s25] sm:$0xff] (%p50_p3)  ;;  %v154_v1 = vld [vmem:[%s139_s25 + $0x8] sm:$0xff] (%p50_p3)  ;;  %v156_v2 = vld [vmem:[%s139_s25 + $0x30] sm:$0xff] (%p50_p3) }
  0x10   : > { %153 = vst [vmem:[%s136_s26] sm:$0xff] (%p50_p3), %v152_v0  ;;  %v158_v3 = vld [vmem:[%s139_s25 + $0x38] sm:$0xff] (%p50_p3) }
  0x11   : > { %155 = vst [vmem:[%s136_s26 + $0x8] sm:$0xff] %v154_v1 }
  0x12   : > { %157 = vst [vmem:[%s136_s26 + $0x10] sm:$0xff] %v156_v2 }
  0x13   : > { %159 = vst [vmem:[%s136_s26 + $0x18] sm:$0xff] %v158_v3 }
  0x14 PF: > { %p399_p5 = scmp.ge.s32.totalorder %s476_s14, 1  ;;  %p172_p6 = scmp.lt.s32.totalorder %s476_s14, 4 }
  0x16   : > { %p173_p7 = pnand %p399_p5, %p172_p6 }
  0x17   : > { %s179_s27 = sand.u32 (!%p173_p7), 1, %s468_s12   ;;  %s401_s5 = sshll.u32 (!%p173_p7), %s392_s15, 2 }
  0x18   : > { %176 = sbr.rel (%p173_p7) target bundleno = 178 (0xb2), region = 51  ;;  %s400_s28 = sshll.u32 (!%p173_p7), %s179_s27, 5 }
  0x19   : > { %s181_s29 = scalar_lea.vmem (!%p173_p7), [#allocation2], %s400_s28  ;;  %p207_p8 = scmp.lt.s32.totalorder (!%p173_p7), %s401_s5, 11 }
  0x1d   : > { %v405_v4 = vld [vmem:[%s181_s29] sm:$0xf]  ;;  %v428_v5 = vld [vmem:[%s181_s29 + $0xc] sm:$0xf0]  ;;  %v426_v6 = vld [vmem:[%s181_s29 + $0x4] sm:$0xf] }
  0x1e   : > { %v406_v7 = vor.u32 %v428_v5, %v405_v4  ;;  %v407_v8 = vld [vmem:[%s181_s29 + $0x10] sm:$0xf0]  ;;  %v413_v9 = vld [vmem:[%s181_s29 + $0x8] sm:$0xf]  ;;  %v429_v10 = vld [vmem:[%s181_s29 + $0x14] sm:$0xf0] }
  0x1f   : > { %v410_v11 = vor.u32 %v426_v6, %v407_v8  ;;  %v414_v12 = vor.u32 %v429_v10, %v413_v9  ;;  %v427_v13 = vld [vmem:[%s181_s29 + $0xc] sm:$0xf]  ;;  %v415_v14 = vld [vmem:[%s181_s29 + $0x18] sm:$0xf0]  ;;  %v217_v16 = vld [vmem:[%s560_s0] sm:$0x1] }
  0x20   : > { %263 = vmatpush.bf16.msra.mxu0 %v406_v7  ;;  %v418_v15 = vor.u32 %v427_v13, %v415_v14  ;;  %vm252_vm0 = vcmask 130048   ;;  %s568_s5 = smov (!%p207_p8, %s401_s5), 11  ;;  %vm315_vm1 = vcmask 1040384   ;;  %vm319_vm2 = vcmask 1042434  }
  0x21   : > { %276 = vmatpush.bf16.msra.mxu1 %v410_v11  ;;  %289 = vmatpush.bf16.msra.mxu2 %v414_v12  ;;  %s209_s8 = scalar_lea.vmem %s562_s2, %s568_s5  ;;  %vm323_vm3 = vcmask 1041408   ;;  %s214_s11 = scalar_lea.vmem %s563_s3, %s568_s5 }
  0x22   : > { %302 = vmatpush.bf16.msra.mxu3 %v418_v15  ;;  %v222_v17 = vld [vmem:[%s209_s8] sm:$0xf] }
  0x23   : > { %419 = vmatmul.msk.bf16.vlgmr.msra.gmra.mxu0 %vm252_vm0, %v217_v16  ;;  %v224_v18 = vperm.slane %v222_v17, 0  ;;  %v225_v19 = vperm.slane %v222_v17, 1  ;;  %v226_v24 = vperm.slane %v222_v17, 2  ;;  %v227_v25 = vperm.slane %v222_v17, 3 }
  0x24   : > { %420 = vmatmul.msk.bf16.vlgmr.msra.gmra.mxu1 %vm252_vm0, %v217_v16  ;;  %421 = vmatmul.msk.bf16.vlgmr.msra.gmra.mxu2 %vm252_vm0, %v217_v16 }
  0x25   : > { %422 = vmatmul.msk.bf16.vlgmr.msra.gmra.mxu3 %vm252_vm0, %v217_v16 }
  0xa0   : > { %v265_v20 = vpop.f32.mrf.mxu0 }
  0xa1   : > { %v278_v21 = vpop.f32.mrf.mxu1  ;;  %v266_v22 = vadd.f32 %v265_v20, %v224_v18 }
  0xa2   : > { %v279_v23 = vadd.f32 %v278_v21, %v225_v19 }
  0xa4   : > { %v308_v26 = vpack.c.bf16 %v279_v23, %v266_v22 }
  0xa6   : > { %v312_v33 = vrot.slane %v308_v26, 3 }
  0xa7   : > { %v291_v27 = vpop.f32.mrf.mxu2 }
  0xa8   : > { %v292_v28 = vadd.f32 %v291_v27, %v226_v24  ;;  %v304_v29 = vpop.f32.mrf.mxu3  ;;  %v267_v30 = vpop.f32.mrf.mxu0  ;;  %v318_v37 = vsel %vm315_vm1, %v308_v26, %v312_v33 }
  0xa9   : > { %v305_v31 = vadd.f32 %v304_v29, %v227_v25  ;;  %v280_v32 = vpop.f32.mrf.mxu1 }
  0xab   : > { %v309_v34 = vpack.c.bf16 %v305_v31, %v292_v28 }
  0xad   : > { %v313_v35 = vrot.slane %v309_v34, 6  ;;  %v314_v36 = vrot.slane %v309_v34, 1 }
  0xaf   : > { %v322_v38 = vsel %vm319_vm2, %v313_v35, %v314_v36  ;;  %v293_v39 = vpop.f32.mrf.mxu2 }
  0xb0   : > { %v324_v40 = vsel %vm323_vm3, %v318_v37, %v322_v38  ;;  %v306_v41 = vpop.f32.mrf.mxu3 }
  0xb1   : > { %326 = vst [vmem:[%s214_s11] sm:$0xf] %v324_v40 }
  0xb2 PF: > { %p10_p9 = scmp.ge.s32.totalorder %s515_s16, 5   ;;  %s564_s12 = smov %s472_s13 }
  0xb3   : > { %s565_s13 = smov %s524_s19  ;;  %s566_s14 = smov %s515_s16 }
  0xb4   :  { %12 = sbr.rel (!%p10_p9) target bundleno = 2 (0x2), region = 93 }

// kernel: _lambda_.5
= control target key start
LH: loop header
LB: loop body
LE: loop exit
PB: predicated region body
PF: predicated region fallthrough
CT: control target
= control target key end

     0   :  { %s750_s15 = smov 0   ;;  %s752_s16 = smov 0   ;;  %s870_s0 = inlined_call_operand.vmem [shape: bf16[64,32], index: 0, kind: input, shape index: {}]   ;;  %s871_s1 = inlined_call_operand.vmem [shape: bf16[32,512], index: 1, kind: input, shape index: {}]   ;;  %s872_s2 = inlined_call_operand.vmem [shape: f32[64,1], index: 2, kind: input, shape index: {}]   ;;  %s873_s3 = inlined_call_operand.vmem [shape: bf16[32,512], index: 3, kind: output, shape index: {0}]   ;;  %s874_s4 = inlined_call_operand.vmem [shape: f32[32,512], index: 4, kind: output, shape index: {1}]  }
   0x1   :  { %s754_s17 = smov 0  }
   0x2 LB: > { %s766_s18 = sadd.s32 4294967295, %s722_s17   ;;  %s769_s19 = sadd.s32 1, %s722_s17   ;;  %s722_s17 = sphi %s754_s17, %s878_s17   ;;  %s718_s16 = sphi %s752_s16, %s877_s16   ;;  %s714_s15 = sphi %s750_s15, %s876_s15  }
   0x3   : > { %s40_s20 = ssub.s32 %s722_s17, %s769_s19  ;;  %s43_s21 = sadd.s32 1, %s718_s16 }
   0x4   : > { %p41_p0 = scmp.eq.s32.totalorder %s40_s20, 0  ;;  %p50_p1 = scmp.ne.s32.totalorder %s718_s16, %s714_s15 }
   0x5   : > { %p51_p2 = scmp.eq.s32.totalorder %s722_s17, 0  ;;  %p101_p3 = scmp.eq.s32.totalorder %s766_s18, 3 }
   0x6   : > { %s779_s22 = scalar_select %p41_p0, %s718_s16, %s43_s21  }
   0x7   : > { %p52_p4 = por %p51_p2, %p50_p1  ;;  %p781_p5 = por %p101_p3, %p50_p1 }
   0x8   : > { %p608_p6 = scmp.ge.s32.totalorder %s722_s17, 4 }
   0xa   : > { %155 = sbr.rel (%p608_p6) target bundleno = 23 (0x17), region = 24 }
   0xf   : > { %158 = sbr.rel (!%p52_p4) target bundleno = 23 (0x17), region = 28  ;;  %s160_s24 = sand.u32 (%p52_p4), 1, %s718_s16  }
  0x10   : > { %s610_s25 = sshll.u32 (%p52_p4), %s722_s17, 2  ;;  %s609_s26 = sshll.u32 (%p52_p4), %s160_s24, 4 }
  0x11   : > { %s164_s29 = scalar_lea.vmem (%p52_p4), %s871_s1, %s610_s25  ;;  %s162_s30 = scalar_lea.vmem (%p52_p4), [#allocation2], %s609_s26 }
  0x12   : > { %v181_v0 = vld [vmem:[%s164_s29] sm:$0xf] (%p52_p4)  ;;  %v183_v1 = vld [vmem:[%s164_s29 + $0x10] sm:$0xf] (%p52_p4) }
  0x13   : > { %182 = vst [vmem:[%s162_s30] sm:$0xf] (%p52_p4), %v181_v0  ;;  %v185_v2 = vld [vmem:[%s164_s29 + $0x20] sm:$0xf] (%p52_p4)  ;;  %v187_v3 = vld [vmem:[%s164_s29 + $0x30] sm:$0xf] (%p52_p4) }
  0x14   : > { %184 = vst [vmem:[%s162_s30 + $0x4] sm:$0xf] %v183_v1 }
  0x15   : > { %186 = vst [vmem:[%s162_s30 + $0x8] sm:$0xf] %v185_v2 }
  0x16   : > { %188 = vst [vmem:[%s162_s30 + $0xc] sm:$0xf] %v187_v3 }
  0x17 PF: > { %p611_p7 = scmp.ge.s32.totalorder %s722_s17, 1  ;;  %p219_p8 = scmp.lt.s32.totalorder %s722_s17, 5 }
  0x19   : > { %p220_p9 = pnand %p611_p7, %p219_p8 }
  0x1a   : > { %s226_s9 = sand.u32 (!%p220_p9), 1, %s714_s15  }
  0x1b   : > { %223 = sbr.rel (%p220_p9) target bundleno = 203 (0xcb), region = 69  ;;  %s802_s10 = sshll.u32 (!%p220_p9), %s226_s9, 4 }
  0x1c   : > { %s228_s11 = scalar_lea.vmem (!%p220_p9), [#allocation2], %s802_s10  ;;  %s614_s14 = sshll.u32 (!%p220_p9), %s226_s9, 5 }
  0x1d   : > { %s837_s17 = scalar_lea.vmem (!%p220_p9), [#allocation4], %s614_s14  ;;  %s247_s15 = scalar_lea.vmem (!%p220_p9), [#allocation3], %s802_s10 }
  0x20   : > { %v269_v4 = vld [vmem:[%s872_s2 + $0x10] sm:$0xff]  ;;  %v267_v5 = vld [vmem:[%s872_s2] sm:$0xff]  ;;  %v724_v6 = vmov 0   ;;  %v653_v9 = vld [vmem:[%s228_s11] sm:$0xff]  ;;  %vm347_vm0 = vcmask 261120   ;;  %s645_s9 = sshll.u32 (%p781_p5), %s766_s18, 2 }
  0x21   : > { %698 = vset.pattern.permute.xlu1 %v724_v6  ;;  %697 = vset.pattern.permute.xlu0 %v724_v6  ;;  %v654_v7 = vld [vmem:[%s228_s11 + $0x8] sm:$0xff]  ;;  %v650_v11 = vld [vmem:[%s870_s0 + $0x8] sm:$0xff]  ;;  %v270_v12 = vld [vmem:[%s872_s2 + $0x18] sm:$0xff]  ;;  %s417_s24 = scalar_lea.vmem (%p781_p5), %s873_s3, %s645_s9 }
  0x22   : > { %287 = vperm.xlu1 %698, %v269_v4   ;;  %277 = vperm.xlu0 %697, %v267_v5   ;;  %v271_v8 = vld [vmem:[%s872_s2 + $0x20] sm:$0xff]  ;;  %v268_v13 = vld [vmem:[%s872_s2 + $0x8] sm:$0xff]  ;;  %v651_v14 = vld [vmem:[%s870_s0 + $0x10] sm:$0xff] }
  0x23   : > { %699 = vset.pattern.permute.xlu2 %v724_v6  ;;  %366 = vmatpush.bf16.msra.mxu0 %v654_v7  ;;  %v649_v10 = vld [vmem:[%s870_s0] sm:$0xff]  ;;  %v652_v15 = vld [vmem:[%s870_s0 + $0x18] sm:$0xff]  ;;  %v272_v16 = vld [vmem:[%s872_s2 + $0x28] sm:$0xff] }
  0x24   : > { %666 = vmatpush.bf16.msra.mxu1 %v654_v7  ;;  %667 = vmatpush.bf16.msra.mxu2 %v654_v7  ;;  %v274_v17 = vld [vmem:[%s872_s2 + $0x38] sm:$0xff]  ;;  %v273_v18 = vld [vmem:[%s872_s2 + $0x30] sm:$0xff] }
  0x25   : > { %668 = vmatpush.bf16.msra.mxu3 %v654_v7  ;;  %297 = vperm.xlu2 %699, %v271_v8  }
  0x27   : > { %367 = vmatpush.bf16.msra.mxu0 %v653_v9 }
  0x28   : > { %669 = vmatpush.bf16.msra.mxu1 %v653_v9  ;;  %670 = vmatpush.bf16.msra.mxu2 %v653_v9 }
  0x29   : > { %671 = vmatpush.bf16.msra.mxu3 %v653_v9 }
  0x2a   : > { %292 = vperm.xlu1 %698, %v270_v12   ;;  %282 = vperm.xlu0 %697, %v268_v13  }
  0x2b   : > { %639 = vmatmul.msk.bf16.vlgmr.msra.gmra.mxu0 %vm347_vm0, %v649_v10  ;;  %640 = vmatmul.msk.bf16.vlgmr.msra.gmra.mxu1 %vm347_vm0, %v650_v11 }
  0x2c   : > { %641 = vmatmul.msk.bf16.vlgmr.msra.gmra.mxu2 %vm347_vm0, %v651_v14  ;;  %642 = vmatmul.msk.bf16.vlgmr.msra.gmra.mxu3 %vm347_vm0, %v652_v15 }
  0x2d   : > { %302 = vperm.xlu2 %699, %v272_v16  }
  0x32   : > { %312 = vperm.xlu1 %698, %v274_v17   ;;  %307 = vperm.xlu0 %697, %v273_v18  }
  0x7f   : > { %v298_v25 = vpop.permute.xlu2 %297 }
  0x87   : > { %v303_v44 = vpop.permute.xlu2 %302 }
  0x94   : > { %v278_v19 = vpop.permute.xlu0 %277  ;;  %v288_v20 = vpop.permute.xlu1 %287 }
  0x9c   : > { %v283_v21 = vpop.permute.xlu0 %282  ;;  %v293_v24 = vpop.permute.xlu1 %292 }
  0xa4   : > { %v308_v26 = vpop.permute.xlu0 %307  ;;  %v313_v43 = vpop.permute.xlu1 %312 }
  0xa8   : > { %v369_v22 = vpop.f32.mrf.mxu0  ;;  %v374_v23 = vpop.f32.mrf.mxu1 }
  0xa9   : > { %v370_v27 = vadd.f32 %v369_v22, %v278_v19  ;;  %v375_v28 = vadd.f32 %v374_v23, %v288_v20 }
  0xab   : > { %v389_v37 = vmax.f32 %v370_v27, 0.0  ;;  %v391_v38 = vmax.f32 %v375_v28, 0.0 }
  0xaf   : > { %v379_v29 = vpop.f32.mrf.mxu2  ;;  %v384_v30 = vpop.f32.mrf.mxu3 }
  0xb0   : > { %v380_v31 = vadd.f32 %v379_v29, %v298_v25  ;;  %v385_v32 = vadd.f32 %v384_v30, %v308_v26  ;;  %v371_v33 = vpop.f32.mrf.mxu0  ;;  %v376_v34 = vpop.f32.mrf.mxu1 }
  0xb1   : > { %v372_v35 = vadd.f32 %v371_v33, %v283_v21  ;;  %v377_v36 = vadd.f32 %v376_v34, %v293_v24 }
  0xb2   : > { %401 = vst [vmem:[%s837_s17] sm:$0xff] %v380_v31 }
  0xb3   : > { %403 = vst [vmem:[%s837_s17 + $0x10] sm:$0xff] %v385_v32  ;;  %v390_v39 = vmax.f32 %v372_v35, 0.0  ;;  %v392_v40 = vmax.f32 %v377_v36, 0.0 }
  0xb5   : > { %v658_v41 = vpack.c.bf16 %v390_v39, %v389_v37  ;;  %v663_v42 = vpack.c.bf16 %v392_v40, %v391_v38 }
  0xb7   : > { %659 = vst [vmem:[%s247_s15] sm:$0xff] %v658_v41   ;;  %v381_v45 = vpop.f32.mrf.mxu2  ;;  %v386_v46 = vpop.f32.mrf.mxu3  ;;  %415 = sbr.rel (!%p781_p5) target bundleno = 195 (0xc3), region = 77 }
  0xb8   : > { %665 = vst [vmem:[%s247_s15 + $0x8] sm:$0xff] %v663_v42   ;;  %v382_v47 = vadd.f32 %v381_v45, %v303_v44  ;;  %v387_v48 = vadd.f32 %v386_v46, %v313_v43 }
  0xba   : > { %402 = vst [vmem:[%s837_s17 + $0x8] sm:$0xff] %v382_v47 }
  0xbb   : > { %404 = vst [vmem:[%s837_s17 + $0x18] sm:$0xff] %v387_v48 }
  0xbe   : > { %v434_v49 = vld [vmem:[%s247_s15] sm:$0xf]  ;;  %v436_v50 = vld [vmem:[%s247_s15 + $0x4] sm:$0xf] }
  0xbf   : > { %v438_v51 = vld [vmem:[%s247_s15 + $0x8] sm:$0xf]  ;;  %435 = vst [vmem:[%s417_s24] sm:$0xf] %v434_v49  ;;  %v440_v52 = vld [vmem:[%s247_s15 + $0xc] sm:$0xf] }
  0xc0   : > { %437 = vst [vmem:[%s417_s24 + $0x10] sm:$0xf] %v436_v50 }
  0xc1   : > { %439 = vst [vmem:[%s417_s24 + $0x20] sm:$0xf] %v438_v51 }
  0xc2   : > { %441 = vst [vmem:[%s417_s24 + $0x30] sm:$0xf] %v440_v52 }
  0xc3 PF: > { %473 = sbr.rel (!%p781_p5) target bundleno = 203 (0xcb), region = 118  ;;  %s646_s10 = sshll.u32 (%p781_p5), %s766_s18, 3  ;;  %v510_v53 = vld [vmem:[%s837_s17] sm:$0xff] (%p781_p5)  ;;  %v514_v55 = vld [vmem:[%s837_s17 + $0x10] sm:$0xff] (%p781_p5) }
  0xc4   : > { %s475_s27 = scalar_lea.vmem (%p781_p5), %s874_s4, %s646_s10 }
  0xc5   : > { %511 = vst [vmem:[%s475_s27] sm:$0xff] (%p781_p5), %v510_v53 }
  0xc6   : > { %515 = vst [vmem:[%s475_s27 + $0x40] sm:$0xff] (%p781_p5), %v514_v55 }
  0xc8   : > { %v512_v54 = vld [vmem:[%s837_s17 + $0x8] sm:$0xff] }
  0xc9   : > { %v516_v56 = vld [vmem:[%s837_s17 + $0x18] sm:$0xff]  ;;  %513 = vst [vmem:[%s475_s27 + $0x20] sm:$0xff] %v512_v54 }
  0xca   : > { %517 = vst [vmem:[%s475_s27 + $0x60] sm:$0xff] %v516_v56 }
  0xcb PF: > { %p12_p10 = scmp.ge.s32.totalorder %s769_s19, 6   ;;  %s876_s15 = smov %s718_s16 }
  0xcc   : > { %s877_s16 = smov %s779_s22  ;;  %s878_s17 = smov %s769_s19 }
  0xcd   :  { %14 = sbr.rel (!%p12_p10) target bundleno = 2 (0x2), region = 199 }

// kernel: _lambda_.6
= control target key start
LH: loop header
LB: loop body
LE: loop exit
PB: predicated region body
PF: predicated region fallthrough
CT: control target
= control target key end

     0   :  { %s727_s15 = smov 0   ;;  %s729_s16 = smov 0   ;;  %s868_s0 = inlined_call_operand.vmem [shape: bf16[8,72], index: 0, kind: input, shape index: {}]   ;;  %s869_s1 = inlined_call_operand.vmem [shape: bf16[72,1536], index: 1, kind: input, shape index: {}]   ;;  %s870_s2 = inlined_call_operand.vmem [shape: f32[8,1], index: 2, kind: input, shape index: {}]   ;;  %s871_s3 = inlined_call_operand.vmem [shape: f32[8,1536], index: 3, kind: input, shape index: {}]   ;;  %s872_s4 = inlined_call_operand.vmem [shape: bf16[8,1536], index: 4, kind: output, shape index: {}]  }
   0x1   :  { %s731_s17 = smov 0  }
   0x2 LB: > { %s551_s18 = sadd.s32 4294967295, %s699_s17   ;;  %s744_s19 = sadd.s32 1, %s699_s17   ;;  %s699_s17 = sphi %s731_s17, %s875_s17   ;;  %s695_s16 = sphi %s729_s16, %s874_s16   ;;  %s691_s15 = sphi %s727_s15, %s873_s15  }
   0x3   : > { %s39_s20 = ssub.s32 %s699_s17, %s744_s19  ;;  %s42_s21 = sadd.s32 1, %s695_s16 }
   0x4   : > { %p40_p0 = scmp.eq.s32.totalorder %s39_s20, 0  ;;  %p49_p1 = scmp.ne.s32.totalorder %s695_s16, %s691_s15 }
   0x5   : > { %p50_p2 = scmp.eq.s32.totalorder %s699_s17, 0  ;;  %p554_p4 = scmp.ge.s32.totalorder %s699_s17, 3 }
   0x6   : > { %s753_s22 = scalar_select %p40_p0, %s695_s16, %s42_s21  }
   0x7   : > { %p51_p3 = por %p50_p2, %p49_p1  ;;  %154 = sbr.rel (%p554_p4) target bundleno = 34 (0x22), region = 24 }
   0xc   : > { %157 = sbr.rel (!%p51_p3) target bundleno = 34 (0x22), region = 28  ;;  %s159_s23 = sand.u32 (%p51_p3), 1, %s695_s16  }
   0xd   : > { %s632_s24 = sshll.u32 (%p51_p3), %s699_s17, 4  ;;  %s649_s25 = smul.u32 (%p51_p3), 144, %s159_s23 }
   0xe   : > { %s761_s28 = scalar_lea.vmem (%p51_p3), %s869_s1, %s632_s24 }
   0xf   : > { %v177_v0 = vld [vmem:[%s761_s28] sm:$0xff] (%p51_p3)  ;;  %v179_v1 = vld [vmem:[%s761_s28 + $0x8] sm:$0xff] (%p51_p3)  ;;  %v181_v2 = vld [vmem:[%s761_s28 + $0x30] sm:$0xff] (%p51_p3)  ;;  %s766_s29 = scalar_lea.vmem (%p51_p3), [#allocation2], %s649_s25 }
  0x10   : > { %178 = vst [vmem:[%s766_s29] sm:$0xff] (%p51_p3), %v177_v0  ;;  %v183_v3 = vld [vmem:[%s761_s28 + $0x38] sm:$0xff] (%p51_p3)  ;;  %v185_v4 = vld [vmem:[%s761_s28 + $0x60] sm:$0xff] (%p51_p3)  ;;  %v187_v5 = vld [vmem:[%s761_s28 + $0x68] sm:$0xff] (%p51_p3) }
  0x11   : > { %180 = vst [vmem:[%s766_s29 + $0x8] sm:$0xff] %v179_v1  ;;  %v189_v6 = vld [vmem:[%s761_s28 + $0x90] sm:$0xff]  ;;  %v191_v7 = vld [vmem:[%s761_s28 + $0x98] sm:$0xff]  ;;  %v193_v8 = vld [vmem:[%s761_s28 + $0xc0] sm:$0xff] }
  0x12   : > { %182 = vst [vmem:[%s766_s29 + $0x10] sm:$0xff] %v181_v2  ;;  %v195_v9 = vld [vmem:[%s761_s28 + $0xc8] sm:$0xff]  ;;  %v197_v10 = vld [vmem:[%s761_s28 + $0xf0] sm:$0xff]  ;;  %v199_v11 = vld [vmem:[%s761_s28 + $0xf8] sm:$0xff] }
  0x13   : > { %184 = vst [vmem:[%s766_s29 + $0x18] sm:$0xff] %v183_v3  ;;  %v201_v12 = vld [vmem:[%s761_s28 + $0x120] sm:$0xff]  ;;  %v203_v13 = vld [vmem:[%s761_s28 + $0x128] sm:$0xff]  ;;  %v205_v14 = vld [vmem:[%s761_s28 + $0x150] sm:$0xff] }
  0x14   : > { %186 = vst [vmem:[%s766_s29 + $0x20] sm:$0xff] %v185_v4  ;;  %v207_v15 = vld [vmem:[%s761_s28 + $0x158] sm:$0xff]  ;;  %v209_v16 = vld [vmem:[%s761_s28 + $0x180] sm:$0xff]  ;;  %v211_v17 = vld [vmem:[%s761_s28 + $0x188] sm:$0xff] }
  0x15   : > { %188 = vst [vmem:[%s766_s29 + $0x28] sm:$0xff] %v187_v5 }
  0x16   : > { %190 = vst [vmem:[%s766_s29 + $0x30] sm:$0xff] %v189_v6 }
  0x17   : > { %192 = vst [vmem:[%s766_s29 + $0x38] sm:$0xff] %v191_v7 }
  0x18   : > { %194 = vst [vmem:[%s766_s29 + $0x40] sm:$0xff] %v193_v8 }
  0x19   : > { %196 = vst [vmem:[%s766_s29 + $0x48] sm:$0xff] %v195_v9 }
  0x1a   : > { %198 = vst [vmem:[%s766_s29 + $0x50] sm:$0xff] %v197_v10 }
  0x1b   : > { %200 = vst [vmem:[%s766_s29 + $0x58] sm:$0xff] %v199_v11 }
  0x1c   : > { %202 = vst [vmem:[%s766_s29 + $0x60] sm:$0xff] %v201_v12 }
  0x1d   : > { %204 = vst [vmem:[%s766_s29 + $0x68] sm:$0xff] %v203_v13 }
  0x1e   : > { %206 = vst [vmem:[%s766_s29 + $0x70] sm:$0xff] %v205_v14 }
  0x1f   : > { %208 = vst [vmem:[%s766_s29 + $0x78] sm:$0xff] %v207_v15 }
  0x20   : > { %210 = vst [vmem:[%s766_s29 + $0x80] sm:$0xff] %v209_v16 }
  0x21   : > { %212 = vst [vmem:[%s766_s29 + $0x88] sm:$0xff] %v211_v17 }
  0x22 PF: > { %p557_p5 = scmp.ge.s32.totalorder %s699_s17, 1  ;;  %p226_p6 = scmp.lt.s32.totalorder %s699_s17, 4 }
  0x24   : > { %p227_p7 = pnand %p557_p5, %p226_p6 }
  0x25   : > { %s233_s30 = sand.u32 (!%p227_p7), 1, %s691_s15   ;;  %s558_s11 = sshll.u32 (!%p227_p7), %s551_s18, 2 }
  0x26   : > { %230 = sbr.rel (%p227_p7) target bundleno = 210 (0xd2), region = 55  ;;  %p265_p8 = scmp.lt.s32.totalorder (!%p227_p7), %s558_s11, 11 }
  0x27   : > { %s650_s5 = smul.u32 (!%p227_p7), 144, %s233_s30 }
  0x29   : > { %s807_s8 = scalar_lea.vmem (!%p227_p7), [#allocation2], %s650_s5 }
  0x2b   : > { %v701_v18 = vmov 0   ;;  %v296_v19 = vld [vmem:[%s870_s2] sm:$0xff]  ;;  %v294_v20 = vld [vmem:[%s807_s8 + $0x80] sm:$0xff]  ;;  %vm396_vm0 = vcmask 1043456   ;;  %v647_v27 = vld [vmem:[%s807_s8 + $0x6c] sm:$0xf0] }
  0x2c   : > { %676 = vset.pattern.permute.xlu0 %v701_v18  ;;  %v295_v21 = vld [vmem:[%s807_s8 + $0x88] sm:$0xff]  ;;  %v352_v22 = vunpack.c.l.b16 %v294_v20  ;;  %v353_v23 = vunpack.c.h.b16 %v294_v20  ;;  %v612_v26 = vld [vmem:[%s807_s8 + $0x60] sm:$0xf]  ;;  %v645_v32 = vld [vmem:[%s807_s8 + $0x64] sm:$0xf]  ;;  %vm392_vm1 = vcmask 588800  }
  0x2d   : > { %299 = vperm.xlu0 %676, %v296_v19   ;;  %v354_v24 = vunpack.c.l.b16 %v295_v21  ;;  %v355_v25 = vunpack.c.h.b16 %v295_v21  ;;  %v614_v33 = vld [vmem:[%s807_s8 + $0x70] sm:$0xf0]  ;;  %v620_v34 = vld [vmem:[%s807_s8 + $0x68] sm:$0xf]  ;;  %v648_v35 = vld [vmem:[%s807_s8 + $0x74] sm:$0xf0]  ;;  %v613_v42 = vor.u32 %v647_v27, %v612_v26 }
  0x2e   : > { %v372_v28 = vpack.c.b16 %v352_v22, %v352_v22  ;;  %v373_v29 = vpack.c.b16 %v353_v23, %v353_v23  ;;  %v646_v36 = vld [vmem:[%s807_s8 + $0x6c] sm:$0xf]  ;;  %v622_v37 = vld [vmem:[%s807_s8 + $0x78] sm:$0xf0]  ;;  %v617_v43 = vor.u32 %v645_v32, %v614_v33  ;;  %v596_v44 = vld [vmem:[%s807_s8 + $0x40] sm:$0xf]  ;;  %v621_v46 = vor.u32 %v648_v35, %v620_v34 }
  0x2f   : > { %v374_v30 = vpack.c.b16 %v354_v24, %v354_v24  ;;  %v375_v31 = vpack.c.b16 %v355_v25, %v355_v25  ;;  %v643_v45 = vld [vmem:[%s807_s8 + $0x4c] sm:$0xf0]  ;;  %v625_v47 = vor.u32 %v646_v36, %v622_v37  ;;  %v641_v48 = vld [vmem:[%s807_s8 + $0x44] sm:$0xf]  ;;  %v598_v49 = vld [vmem:[%s807_s8 + $0x50] sm:$0xf0] }
  0x30   : > { %v398_v38 = vsel %vm396_vm0, %v372_v28, 0  ;;  %v401_v39 = vsel %vm396_vm0, %v373_v29, 0  ;;  %v604_v50 = vld [vmem:[%s807_s8 + $0x48] sm:$0xf]  ;;  %v644_v51 = vld [vmem:[%s807_s8 + $0x54] sm:$0xf0]  ;;  %v597_v54 = vor.u32 %v643_v45, %v596_v44  ;;  %v601_v55 = vor.u32 %v641_v48, %v598_v49 }
  0x31   : > { %v404_v40 = vsel %vm396_vm0, %v374_v30, 0  ;;  %v407_v41 = vsel %vm396_vm0, %v375_v31, 0  ;;  %412 = vmatpush.bf16.msra.mxu0 %v398_v38  ;;  %425 = vmatpush.bf16.msra.mxu1 %v401_v39  ;;  %v642_v52 = vld [vmem:[%s807_s8 + $0x4c] sm:$0xf]  ;;  %v606_v53 = vld [vmem:[%s807_s8 + $0x58] sm:$0xf0]  ;;  %v605_v58 = vor.u32 %v644_v51, %v604_v50 }
  0x32   : > { %438 = vmatpush.bf16.msra.mxu2 %v404_v40  ;;  %451 = vmatpush.bf16.msra.mxu3 %v407_v41  ;;  %v580_v56 = vld [vmem:[%s807_s8 + $0x20] sm:$0xf]  ;;  %v639_v57 = vld [vmem:[%s807_s8 + $0x2c] sm:$0xf0]  ;;  %v609_v59 = vor.u32 %v642_v52, %v606_v53  ;;  %v637_v60 = vld [vmem:[%s807_s8 + $0x24] sm:$0xf] }
  0x33   : > { %v582_v61 = vld [vmem:[%s807_s8 + $0x30] sm:$0xf0]  ;;  %v588_v62 = vld [vmem:[%s807_s8 + $0x28] sm:$0xf]  ;;  %v640_v63 = vld [vmem:[%s807_s8 + $0x34] sm:$0xf0]  ;;  %v581_v2 = vor.u32 %v639_v57, %v580_v56 }
  0x34   : > { %v638_v0 = vld [vmem:[%s807_s8 + $0x2c] sm:$0xf]  ;;  %v590_v1 = vld [vmem:[%s807_s8 + $0x38] sm:$0xf0]  ;;  %v585_v3 = vor.u32 %v637_v60, %v582_v61  ;;  %v564_v4 = vld [vmem:[%s807_s8] sm:$0xf]  ;;  %v589_v6 = vor.u32 %v640_v63, %v588_v62 }
  0x35   : > { %413 = vmatpush.bf16.msra.mxu0 %v613_v42  ;;  %426 = vmatpush.bf16.msra.mxu1 %v617_v43  ;;  %v635_v5 = vld [vmem:[%s807_s8 + $0xc] sm:$0xf0]  ;;  %v593_v7 = vor.u32 %v638_v0, %v590_v1  ;;  %v633_v8 = vld [vmem:[%s807_s8 + $0x4] sm:$0xf]  ;;  %v566_v9 = vld [vmem:[%s807_s8 + $0x10] sm:$0xf0] }
  0x36   : > { %439 = vmatpush.bf16.msra.mxu2 %v621_v46  ;;  %452 = vmatpush.bf16.msra.mxu3 %v625_v47  ;;  %v572_v10 = vld [vmem:[%s807_s8 + $0x8] sm:$0xf]  ;;  %v636_v11 = vld [vmem:[%s807_s8 + $0x14] sm:$0xf0]  ;;  %v634_v12 = vld [vmem:[%s807_s8 + $0xc] sm:$0xf]  ;;  %v565_v14 = vor.u32 %v635_v5, %v564_v4  ;;  %v569_v15 = vor.u32 %v633_v8, %v566_v9 }
  0x37   : > { %v574_v13 = vld [vmem:[%s807_s8 + $0x18] sm:$0xf0]  ;;  %v573_v16 = vor.u32 %v636_v11, %v572_v10  ;;  %v277_v18 = vld [vmem:[%s868_s0] sm:$0xf]  ;;  %s877_s11 = smov (!%p265_p8, %s558_s11), 11 }
  0x38   : > { %v577_v17 = vor.u32 %v634_v12, %v574_v13  ;;  %s559_s12 = sshll.u32 %s877_s11, 3  ;;  %s561_s20 = sshll.u32 %s877_s11, 2 }
  0x39   : > { %414 = vmatpush.bf16.msra.mxu0 %v597_v54  ;;  %427 = vmatpush.bf16.msra.mxu1 %v601_v55  ;;  %s268_s15 = scalar_lea.vmem %s871_s3, %s559_s12  ;;  %s274_s21 = scalar_lea.vmem %s872_s4, %s561_s20 }
  0x3a   : > { %440 = vmatpush.bf16.msra.mxu2 %v605_v58  ;;  %453 = vmatpush.bf16.msra.mxu3 %v609_v59  ;;  %v461_v22 = vld [vmem:[%s268_s15] sm:$0xff]  ;;  %v462_v23 = vld [vmem:[%s268_s15 + $0x8] sm:$0xff]  ;;  %v463_v32 = vld [vmem:[%s268_s15 + $0x10] sm:$0xff] }
  0x3b   : > { %v464_v34 = vld [vmem:[%s268_s15 + $0x18] sm:$0xff] }
  0x3d   : > { %415 = vmatpush.bf16.msra.mxu0 %v581_v2  ;;  %428 = vmatpush.bf16.msra.mxu1 %v585_v3 }
  0x3e   : > { %441 = vmatpush.bf16.msra.mxu2 %v589_v6  ;;  %454 = vmatpush.bf16.msra.mxu3 %v593_v7 }
  0x41   : > { %416 = vmatpush.bf16.msra.mxu0 %v565_v14  ;;  %429 = vmatpush.bf16.msra.mxu1 %v569_v15 }
  0x42   : > { %442 = vmatpush.bf16.msra.mxu2 %v573_v16  ;;  %455 = vmatpush.bf16.msra.mxu3 %v577_v17 }
  0x44   : > { %626 = vmatmul.msk.bf16.vlgmr.msra.gmra.mxu0 %vm392_vm1, %v277_v18  ;;  %627 = vmatmul.msk.bf16.vlgmr.msra.gmra.mxu1 %vm392_vm1, %v277_v18 }
  0x45   : > { %628 = vmatmul.msk.bf16.vlgmr.msra.gmra.mxu2 %vm392_vm1, %v277_v18  ;;  %629 = vmatmul.msk.bf16.vlgmr.msra.gmra.mxu3 %vm392_vm1, %v277_v18 }
  0x9f   : > { %v300_v19 = vpop.permute.xlu0 %299 }
  0xc1   : > { %v418_v20 = vpop.f32.mrf.mxu0  ;;  %v431_v21 = vpop.f32.mrf.mxu1 }
  0xc2   : > { %v419_v24 = vadd.f32 %v418_v20, %v300_v19  ;;  %v432_v25 = vadd.f32 %v431_v21, %v300_v19 }
  0xc4   : > { %v465_v26 = vadd.f32 %v461_v22, %v419_v24  ;;  %v466_v27 = vadd.f32 %v462_v23, %v432_v25 }
  0xc6   : > { %v469_v28 = vmax.f32 %v465_v26, 0.0  ;;  %v470_v29 = vmax.f32 %v466_v27, 0.0 }
  0xc8   : > { %v473_v30 = vpack.c.bf16 %v470_v29, %v469_v28  ;;  %v444_v31 = vpop.f32.mrf.mxu2  ;;  %v457_v33 = vpop.f32.mrf.mxu3 }
  0xc9   : > { %v445_v35 = vadd.f32 %v444_v31, %v300_v19  ;;  %v458_v36 = vadd.f32 %v457_v33, %v300_v19  ;;  %v420_v37 = vpop.f32.mrf.mxu0  ;;  %v433_v38 = vpop.f32.mrf.mxu1 }
  0xca   : > { %475 = vst [vmem:[%s274_s21] sm:$0xff] %v473_v30 }
  0xcb   : > { %v467_v39 = vadd.f32 %v463_v32, %v445_v35  ;;  %v468_v40 = vadd.f32 %v464_v34, %v458_v36 }
  0xcd   : > { %v471_v41 = vmax.f32 %v467_v39, 0.0  ;;  %v472_v42 = vmax.f32 %v468_v40, 0.0 }
  0xcf   : > { %v474_v43 = vpack.c.bf16 %v472_v42, %v471_v41 }
  0xd0   : > { %v446_v44 = vpop.f32.mrf.mxu2  ;;  %v459_v45 = vpop.f32.mrf.mxu3 }
  0xd1   : > { %476 = vst [vmem:[%s274_s21 + $0x8] sm:$0xff] %v474_v43 }
  0xd2 PF: > { %p11_p9 = scmp.ge.s32.totalorder %s744_s19, 5   ;;  %s873_s15 = smov %s695_s16 }
  0xd3   : > { %s874_s16 = smov %s753_s22  ;;  %s875_s17 = smov %s744_s19 }
  0xd4   :  { %13 = sbr.rel (!%p11_p9) target bundleno = 2 (0x2), region = 97 }

// kernel: _lambda_.7
= control target key start
LH: loop header
LB: loop body
LE: loop exit
PB: predicated region body
PF: predicated region fallthrough
CT: control target
= control target key end

     0   :  { %s571_s12 = smov 0   ;;  %s573_s13 = smov 0   ;;  %s662_s0 = inlined_call_operand.vmem [shape: bf16[16,32], index: 0, kind: input, shape index: {}]   ;;  %s663_s1 = inlined_call_operand.vmem [shape: bf16[32,2048], index: 1, kind: input, shape index: {}]   ;;  %s664_s2 = inlined_call_operand.vmem [shape: f32[16,1], index: 2, kind: input, shape index: {}]   ;;  %s665_s3 = inlined_call_operand.vmem [shape: f32[16,2048], index: 3, kind: output, shape index: {}]  }
   0x1   :  { %s575_s14 = smov 0  }
   0x2 LB: > { %s434_s15 = sadd.s32 4294967295, %s548_s14   ;;  %s588_s16 = sadd.s32 1, %s548_s14   ;;  %s548_s14 = sphi %s575_s14, %s669_s14   ;;  %s544_s13 = sphi %s573_s13, %s668_s13   ;;  %s540_s12 = sphi %s571_s12, %s667_s12  }
   0x3   : > { %s38_s17 = ssub.s32 %s548_s14, %s588_s16  ;;  %s41_s18 = sadd.s32 1, %s544_s13 }
   0x4   : > { %p39_p0 = scmp.eq.s32.totalorder %s38_s17, 0  ;;  %p48_p1 = scmp.ne.s32.totalorder %s544_s13, %s540_s12 }
   0x5   : > { %p49_p2 = scmp.eq.s32.totalorder %s548_s14, 0  ;;  %p99_p3 = scmp.eq.s32.totalorder %s434_s15, 3 }
   0x6   : > { %s599_s19 = scalar_select %p39_p0, %s544_s13, %s41_s18  }
   0x7   : > { %p50_p4 = por %p49_p2, %p48_p1  ;;  %p601_p5 = por %p99_p3, %p48_p1 }
   0x8   : > { %p437_p6 = scmp.ge.s32.totalorder %s548_s14, 4 }
   0xa   : > { %127 = sbr.rel (%p437_p6) target bundleno = 27 (0x1b), region = 24 }
   0xf   : > { %130 = sbr.rel (!%p50_p4) target bundleno = 27 (0x1b), region = 28  ;;  %s132_s21 = sand.u32 (%p50_p4), 1, %s544_s13  }
  0x10   : > { %s489_s22 = sshll.u32 (%p50_p4), %s548_s14, 4  ;;  %s438_s23 = sshll.u32 (%p50_p4), %s132_s21, 6 }
  0x11   : > { %s137_s26 = scalar_lea.vmem (%p50_p4), %s663_s1, %s489_s22  ;;  %s134_s27 = scalar_lea.vmem (%p50_p4), [#allocation2], %s438_s23 }
  0x12   : > { %v150_v0 = vld [vmem:[%s137_s26] sm:$0xff] (%p50_p4)  ;;  %v152_v1 = vld [vmem:[%s137_s26 + $0x8] sm:$0xff] (%p50_p4) }
  0x13   : > { %v154_v2 = vld [vmem:[%s137_s26 + $0x40] sm:$0xff] (%p50_p4)  ;;  %151 = vst [vmem:[%s134_s27] sm:$0xff] (%p50_p4), %v150_v0  ;;  %v156_v3 = vld [vmem:[%s137_s26 + $0x48] sm:$0xff] (%p50_p4) }
  0x14   : > { %153 = vst [vmem:[%s134_s27 + $0x8] sm:$0xff] %v152_v1  ;;  %v158_v4 = vld [vmem:[%s137_s26 + $0x80] sm:$0xff]  ;;  %v160_v5 = vld [vmem:[%s137_s26 + $0x88] sm:$0xff] }
  0x15   : > { %155 = vst [vmem:[%s134_s27 + $0x10] sm:$0xff] %v154_v2  ;;  %v162_v6 = vld [vmem:[%s137_s26 + $0xc0] sm:$0xff]  ;;  %v164_v7 = vld [vmem:[%s137_s26 + $0xc8] sm:$0xff] }
  0x16   : > { %157 = vst [vmem:[%s134_s27 + $0x18] sm:$0xff] %v156_v3 }
  0x17   : > { %159 = vst [vmem:[%s134_s27 + $0x20] sm:$0xff] %v158_v4 }
  0x18   : > { %161 = vst [vmem:[%s134_s27 + $0x28] sm:$0xff] %v160_v5 }
  0x19   : > { %163 = vst [vmem:[%s134_s27 + $0x30] sm:$0xff] %v162_v6 }
  0x1a   : > { %165 = vst [vmem:[%s134_s27 + $0x38] sm:$0xff] %v164_v7 }
  0x1b PF: > { %p441_p7 = scmp.ge.s32.totalorder %s548_s14, 1  ;;  %p170_p8 = scmp.lt.s32.totalorder %s548_s14, 5 }
  0x1d   : > { %p171_p9 = pnand %p441_p7, %p170_p8 }
  0x1e   : > { %s177_s28 = sand.u32 (!%p171_p9), 1, %s540_s12  }
  0x1f   : > { %174 = sbr.rel (%p171_p9) target bundleno = 200 (0xc8), region = 51  ;;  %s617_s4 = sshll.u32 (!%p171_p9), %s177_s28, 6 }
  0x20   : > { %s179_s5 = scalar_lea.vmem (!%p171_p9), [#allocation2], %s617_s4  ;;  %s627_s10 = scalar_lea.vmem (!%p171_p9), [#allocation3], %s617_s4 }
  0x24   : > { %v212_v8 = vld [vmem:[%s664_s2] sm:$0xff]  ;;  %v550_v9 = vmov 0   ;;  %v466_v10 = vld [vmem:[%s179_s5 + $0x20] sm:$0xf]  ;;  %v497_v11 = vld [vmem:[%s179_s5 + $0x2c] sm:$0xf0] }
  0x25   : > { %525 = vset.pattern.permute.xlu0 %v550_v9  ;;  %v495_v12 = vld [vmem:[%s179_s5 + $0x24] sm:$0xf]  ;;  %v467_v13 = vor.u32 %v497_v11, %v466_v10  ;;  %v468_v14 = vld [vmem:[%s179_s5 + $0x30] sm:$0xf0]  ;;  %v474_v15 = vld [vmem:[%s179_s5 + $0x28] sm:$0xf] }
  0x26   : > { %216 = vperm.xlu0 %525, %v212_v8   ;;  %v498_v16 = vld [vmem:[%s179_s5 + $0x34] sm:$0xf0]  ;;  %v471_v17 = vor.u32 %v495_v12, %v468_v14  ;;  %v496_v19 = vld [vmem:[%s179_s5 + $0x2c] sm:$0xf]  ;;  %v476_v20 = vld [vmem:[%s179_s5 + $0x38] sm:$0xf0] }
  0x27   : > { %v475_v18 = vor.u32 %v498_v16, %v474_v15  ;;  %v450_v21 = vld [vmem:[%s179_s5] sm:$0xf]  ;;  %279 = vmatpush.bf16.msra.mxu0 %v467_v13  ;;  %v479_v23 = vor.u32 %v496_v19, %v476_v20  ;;  %v493_v24 = vld [vmem:[%s179_s5 + $0xc] sm:$0xf0]  ;;  %v491_v25 = vld [vmem:[%s179_s5 + $0x4] sm:$0xf] }
  0x28   : > { %v213_v22 = vld [vmem:[%s664_s2 + $0x8] sm:$0xff]  ;;  %v452_v26 = vld [vmem:[%s179_s5 + $0x10] sm:$0xf0]  ;;  %293 = vmatpush.bf16.msra.mxu1 %v471_v17  ;;  %v451_v27 = vor.u32 %v493_v24, %v450_v21  ;;  %v458_v29 = vld [vmem:[%s179_s5 + $0x8] sm:$0xf]  ;;  %vm269_vm0 = vcmask 261120  }
  0x29   : > { %307 = vmatpush.bf16.msra.mxu2 %v475_v18  ;;  %v455_v28 = vor.u32 %v491_v25, %v452_v26  ;;  %v494_v30 = vld [vmem:[%s179_s5 + $0x14] sm:$0xf0]  ;;  %v492_v31 = vld [vmem:[%s179_s5 + $0xc] sm:$0xf]  ;;  %321 = vmatpush.bf16.msra.mxu3 %v479_v23  ;;  %v460_v33 = vld [vmem:[%s179_s5 + $0x18] sm:$0xf0] }
  0x2a   : > { %v459_v32 = vor.u32 %v494_v30, %v458_v29  ;;  %v463_v34 = vor.u32 %v492_v31, %v460_v33  ;;  %v490_v35 = vld [vmem:[%s662_s0] sm:$0xff]  ;;  %s499_s11 = sshll.u32 (%p601_p5), %s434_s15, 5 }
  0x2b   : > { %280 = vmatpush.bf16.msra.mxu0 %v451_v27  ;;  %s346_s18 = scalar_lea.vmem (%p601_p5), %s665_s3, %s499_s11 }
  0x2c   : > { %294 = vmatpush.bf16.msra.mxu1 %v455_v28 }
  0x2d   : > { %308 = vmatpush.bf16.msra.mxu2 %v459_v32  ;;  %322 = vmatpush.bf16.msra.mxu3 %v463_v34 }
  0x2e   : > { %221 = vperm.xlu0 %525, %v213_v22   ;;  %480 = vmatmul.msk.bf16.vlgmr.msra.gmra.mxu0 %vm269_vm0, %v490_v35 }
  0x2f   : > { %481 = vmatmul.msk.bf16.vlgmr.msra.gmra.mxu1 %vm269_vm0, %v490_v35 }
  0x30   : > { %482 = vmatmul.msk.bf16.vlgmr.msra.gmra.mxu2 %vm269_vm0, %v490_v35  ;;  %483 = vmatmul.msk.bf16.vlgmr.msra.gmra.mxu3 %vm269_vm0, %v490_v35 }
  0x98   : > { %v217_v36 = vpop.permute.xlu0 %216 }
  0xa0   : > { %v222_v41 = vpop.permute.xlu0 %221 }
  0xab   : > { %v282_v37 = vpop.f32.mrf.mxu0 }
  0xac   : > { %v283_v38 = vadd.f32 %v282_v37, %v217_v36  ;;  %v296_v39 = vpop.f32.mrf.mxu1 }
  0xad   : > { %v297_v40 = vadd.f32 %v296_v39, %v217_v36 }
  0xae   : > { %329 = vst [vmem:[%s627_s10] sm:$0xff] %v283_v38 }
  0xaf   : > { %330 = vst [vmem:[%s627_s10 + $0x8] sm:$0xff] %v297_v40 }
  0xb3   : > { %v310_v42 = vpop.f32.mrf.mxu2  ;;  %v324_v44 = vpop.f32.mrf.mxu3 }
  0xb4   : > { %v311_v43 = vadd.f32 %v310_v42, %v217_v36  ;;  %v284_v45 = vpop.f32.mrf.mxu0  ;;  %v325_v46 = vadd.f32 %v324_v44, %v217_v36  ;;  %v298_v48 = vpop.f32.mrf.mxu1 }
  0xb5   : > { %v285_v47 = vadd.f32 %v284_v45, %v222_v41  ;;  %v299_v49 = vadd.f32 %v298_v48, %v222_v41  ;;  %v359_v54 = vld [vmem:[%s627_s10] sm:$0xff] (%p601_p5) }
  0xb6   : > { %331 = vst [vmem:[%s627_s10 + $0x10] sm:$0xff] %v311_v43  ;;  %v361_v55 = vld [vmem:[%s627_s10 + $0x8] sm:$0xff] (%p601_p5) }
  0xb7   : > { %332 = vst [vmem:[%s627_s10 + $0x18] sm:$0xff] %v325_v46 }
  0xb8   : > { %333 = vst [vmem:[%s627_s10 + $0x20] sm:$0xff] %v285_v47 }
  0xb9   : > { %334 = vst [vmem:[%s627_s10 + $0x28] sm:$0xff] %v299_v49 }
  0xba   : > { %360 = vst [vmem:[%s346_s18] sm:$0xff] (%p601_p5), %v359_v54 }
  0xbb   : > { %v312_v50 = vpop.f32.mrf.mxu2  ;;  %v326_v52 = vpop.f32.mrf.mxu3  ;;  %343 = sbr.rel (!%p601_p5) target bundleno = 200 (0xc8), region = 59  ;;  %362 = vst [vmem:[%s346_s18 + $0x8] sm:$0xff] (%p601_p5), %v361_v55 }
  0xbc   : > { %v313_v51 = vadd.f32 %v312_v50, %v222_v41  ;;  %v327_v53 = vadd.f32 %v326_v52, %v222_v41 }
  0xbd   : > { %v363_v56 = vld [vmem:[%s627_s10 + $0x10] sm:$0xff] (%p601_p5) }
  0xbe   : > { %335 = vst [vmem:[%s627_s10 + $0x30] sm:$0xff] %v313_v51  ;;  %v365_v57 = vld [vmem:[%s627_s10 + $0x18] sm:$0xff] (%p601_p5) }
  0xbf   : > { %336 = vst [vmem:[%s627_s10 + $0x38] sm:$0xff] %v327_v53  ;;  %v367_v58 = vld [vmem:[%s627_s10 + $0x20] sm:$0xff] (%p601_p5) }
  0xc0   : > { %364 = vst [vmem:[%s346_s18 + $0x10] sm:$0xff] %v363_v56  ;;  %v369_v59 = vld [vmem:[%s627_s10 + $0x28] sm:$0xff] }
  0xc1   : > { %366 = vst [vmem:[%s346_s18 + $0x18] sm:$0xff] %v365_v57 }
  0xc2   : > { %368 = vst [vmem:[%s346_s18 + $0x80] sm:$0xff] %v367_v58 }
  0xc3   : > { %370 = vst [vmem:[%s346_s18 + $0x88] sm:$0xff] %v369_v59 }
  0xc5   : > { %v371_v60 = vld [vmem:[%s627_s10 + $0x30] sm:$0xff] }
  0xc6   : > { %v373_v61 = vld [vmem:[%s627_s10 + $0x38] sm:$0xff]  ;;  %372 = vst [vmem:[%s346_s18 + $0x90] sm:$0xff] %v371_v60 }
  0xc7   : > { %374 = vst [vmem:[%s346_s18 + $0x98] sm:$0xff] %v373_v61 }
  0xc8 PF: > { %p10_p10 = scmp.ge.s32.totalorder %s588_s16, 6   ;;  %s667_s12 = smov %s544_s13 }
  0xc9   : > { %s668_s13 = smov %s599_s19  ;;  %s669_s14 = smov %s588_s16 }
  0xca   :  { %12 = sbr.rel (!%p10_p10) target bundleno = 2 (0x2), region = 113 }

</bundles_post_ra>
